<compile_context>
chip_gen: v7x
topology: tpu7x:2x2x1
jax: 0.10.0
libtpu: 0.0.40
codegen_flags: <defaults>
</compile_context>

<pallas_src>
import functools

import jax
import jax.numpy as jnp
from jax import lax
from jax.experimental import pallas as pl
from jax.experimental.pallas import tpu as pltpu


def _round_up(x, m):
    return (x + m - 1) // m * m


def _supcon_kernel(anchor_ref, feat_ref, lbl_row_ref, lbl_col_ref, ccm_ref,
                   out_ref, *, inv_temp):
    # anchor_ref : [TM, Dp] bf16/f32 -- this block's anchor rows (pipelined)
    # feat_ref   : [Np, Dp] bf16/f32 -- resident contrast features
    # lbl_row_ref: [TM, 1]  i32      -- anchor labels for this block
    # lbl_col_ref: [1,  Np] i32      -- contrast labels (-1 = padding)
    # ccm_ref    : [TM, 1]  f32      -- curr_class_mask weights (0 on padding)
    # out_ref    : [TM, 1]  f32      -- per-row weighted mean_log_prob_pos
    tm = out_ref.shape[0]
    n_pad = feat_ref.shape[0]

    # anchor . contrast^T / temperature on the MXU: contract last dims of both
    # operands (no transpose materialized), accumulate in f32.
    adc = lax.dot_general(
        anchor_ref[...], feat_ref[...],
        dimension_numbers=(((1,), (1,)), ((), ())),
        preferred_element_type=jnp.float32) * inv_temp          # [TM, Np] f32

    # Row max taken directly over adc: padded columns contribute exactly 0
    # (zero feature rows) which can only raise the max, and the forward value
    # is shift-invariant, so this is exact and saves a [TM,Np] select.
    row_max = jnp.max(adc, axis=1, keepdims=True)               # [TM, 1]
    logits = adc - row_max                                      # [TM, Np]

    # One narrow iota per axis; all compares broadcast to [TM, Np].
    row_ids = (pl.program_id(0) * tm
               + lax.broadcasted_iota(jnp.int32, (tm, 1), 0))   # [TM, 1]
    col_ids = lax.broadcasted_iota(jnp.int32, (1, n_pad), 1)    # [1, Np]
    lbl_c = lbl_col_ref[...]                                    # [1, Np]

    not_self = row_ids != col_ids                               # global diagonal
    valid = jnp.logical_and(not_self, lbl_c >= 0)               # & non-padding
    pos = jnp.logical_and(lbl_row_ref[...] == lbl_c, valid)     # positives

    exp_sum = jnp.sum(jnp.where(valid, jnp.exp(logits), 0.0),
                      axis=1, keepdims=True)                    # [TM, 1]
    log_denom = jnp.log(exp_sum)

    pos_cnt = jnp.sum(jnp.where(pos, 1.0, 0.0), axis=1, keepdims=True)
    pos_logit_sum = jnp.sum(jnp.where(pos, logits, 0.0), axis=1, keepdims=True)

    # mean_log_prob_pos = sum_pos(logits - log_denom) / count
    #                   = (sum_pos(logits) - count * log_denom) / count
    # Guarded denominator -> 0 (not NaN) for rows with no positives (only
    # padded rows here), which also carry weight 0.
    mlpp = (pos_logit_sum - pos_cnt * log_denom) / jnp.maximum(pos_cnt, 1.0)

    # Weight by curr_class_mask; -(T/base_T) and 1/N folded into the final
    # scalar reduction in the wrapper.
    out_ref[...] = mlpp * ccm_ref[...]


def supcon_loss_pallas(features, labels, target_labels, temperature=0.07,
                       base_temperature=0.07, block_rows=256,
                       matmul_dtype=jnp.bfloat16):
    """features: [bsz, n_views, D] f32; labels: [bsz] int; target_labels: list[int]."""
    bsz, n_views, d = features.shape
    n = bsz * n_views

    # TM=256 amortizes per-step overhead and the 256-wide MXU pass, but shrink
    # so the grid keeps >=2 blocks when possible (v7x has 2 TCs sharing the
    # "parallel" axis) and never overshoots the padded row count.
    assert block_rows % 128 == 0
    tm = block_rows
    while tm > 128 and _round_up(n, tm) // tm < 2:
        tm //= 2
    n_pad = _round_up(n, tm)
    d_pad = _round_up(d, 128)
    n_blocks = n_pad // tm

    # contrast_feature = torch.cat(torch.unbind(features, dim=1), dim=0)
    # (cast fused into the reshape pass; one jnp.pad for both axes).
    cf = jnp.transpose(features, (1, 0, 2)).reshape(n, d).astype(matmul_dtype)
    feat = jnp.pad(cf, ((0, n_pad - n), (0, d_pad - d)))

    labels_i = labels.astype(jnp.int32)
    lbl_full = jnp.tile(labels_i, n_views)                        # (n,)
    lbl_pad = jnp.full((n_pad,), -1, jnp.int32).at[:n].set(lbl_full)
    lbl_row = lbl_pad.reshape(n_pad, 1)
    lbl_col = lbl_pad.reshape(1, n_pad)

    # curr_class_mask (per sample), tiled over views; padding gets weight 0.
    ccm = jnp.zeros((bsz,), jnp.float32)
    for tc in target_labels:
        ccm = ccm + (labels_i == tc).astype(jnp.float32)
    ccm_pad = jnp.zeros((n_pad, 1), jnp.float32).at[:n, 0].set(
        jnp.tile(ccm, n_views))

    # VMEM budget from actual per-step usage (+ headroom), capped at ~75% of
    # the queried physical VMEM (64 MiB/TC on v7x, 128 MiB on v5e/v6e).
    try:
        vmem_phys = int(pltpu.get_tpu_info().vmem_capacity_bytes)
    except Exception:
        vmem_phys = 64 << 20                   # conservative: v7x per-TC
    vmem_cap = (vmem_phys * 3) // 4

    fb = jnp.dtype(matmul_dtype).itemsize
    est = (n_pad * d_pad * fb                  # resident contrast (single buf)
           + 2 * tm * d_pad * fb               # anchor tile (double-buffered)
           + 8 * tm * n_pad * 4                # [TM, Np] f32/bool temporaries
           + 4 * (n_pad + 3 * tm) * 4)         # label / weight / output blocks
    vmem_limit = int(min(max(2 * est, 16 << 20), vmem_cap))

    kernel = functools.partial(_supcon_kernel,
                               inv_temp=1.0 / float(temperature))
    out_shape = jax.ShapeDtypeStruct((n_pad, 1), jnp.float32)

    def build(single_buffer_resident):
        # Constant-index_map blocks gain nothing from double-buffering;
        # Buffered(1) halves the dominant VMEM term (gates TM on 64 MiB v7x).
        res_kw = ({"pipeline_mode": pl.Buffered(1)}
                  if single_buffer_resident else {})
        grid_spec = pltpu.PrefetchScalarGridSpec(
            num_scalar_prefetch=0,
            grid=(n_blocks,),
            in_specs=[
                pl.BlockSpec((tm, d_pad), lambda i: (i, 0)),            # anchor rows
                pl.BlockSpec((n_pad, d_pad), lambda i: (0, 0), **res_kw),  # contrast (resident)
                pl.BlockSpec((tm, 1), lambda i: (i, 0)),                # anchor labels
                pl.BlockSpec((1, n_pad), lambda i: (0, 0), **res_kw),   # contrast labels
                pl.BlockSpec((tm, 1), lambda i: (i, 0)),                # anchor weights
            ],
            out_specs=pl.BlockSpec((tm, 1), lambda i: (i, 0)),
        )
        return pl.pallas_call(
            kernel,
            out_shape=out_shape,
            grid_spec=grid_spec,
            compiler_params=pltpu.CompilerParams(
                dimension_semantics=("parallel",),
                vmem_limit_bytes=vmem_limit,
            ),
        )

    args = (feat, feat, lbl_row, lbl_col, ccm_pad)
    try:
        per_row = build(True)(*args)
    except Exception:
        # Fallback for jax versions that reject pipeline_mode=pl.Buffered(1).
        per_row = build(False)(*args)

    # mean over the N real anchors, with -(T/base_T) folded in (one scalar op).
    return (-(temperature / base_temperature) / n) * jnp.sum(per_row)


def _supcon_loss_ref(features, labels, target_labels, temperature=0.07,
                     base_temperature=0.07, matmul_dtype=jnp.bfloat16):
    """Pure-JAX reference mirroring the PyTorch forward (contrast_mode='all', mean).

    Features go through the same low-precision rounding as the kernel's MXU
    inputs so the comparison tolerance can stay tight.
    """
    bsz, n_views, d = features.shape
    n = bsz * n_views
    cf = jnp.transpose(features, (1, 0, 2)).reshape(n, d).astype(jnp.float32)
    cfq = cf.astype(matmul_dtype).astype(jnp.float32)
    adc = (cfq @ cfq.T) / temperature
    logits = adc - jnp.max(adc, axis=1, keepdims=True)
    lbl = jnp.tile(labels.astype(jnp.int32), n_views).reshape(n, 1)
    mask = (lbl == lbl.T).astype(jnp.float32)
    logits_mask = 1.0 - jnp.eye(n, dtype=jnp.float32)
    mask = mask * logits_mask
    exp_logits = jnp.exp(logits) * logits_mask
    log_prob = logits - jnp.log(exp_logits.sum(1, keepdims=True))
    mlpp = (mask * log_prob).sum(1) / mask.sum(1)
    loss = -(temperature / base_temperature) * mlpp
    ccm = jnp.zeros((bsz,), jnp.float32)
    for tc in target_labels:
        ccm = ccm + (labels == tc).astype(jnp.float32)
    loss = ccm[None, :] * loss.reshape(n_views, bsz)
    return loss.mean()


if __name__ == "__main__":
    key = jax.random.PRNGKey(0)
    bsz, n_views, d = 8, 2, 32
    kf, kl = jax.random.split(key)

    features = jax.random.normal(kf, (bsz, n_views, d), dtype=jnp.float32)
    # L2-normalize per-sample as in Co2L usage (not required by the loss itself)
    features = features / jnp.linalg.norm(features, axis=-1, keepdims=True)
    labels = jax.random.randint(kl, (bsz,), 0, 4, dtype=jnp.int32)
    target_labels = [2, 3]

    out = supcon_loss_pallas(features, labels, target_labels)
    out = jax.block_until_ready(out)

    ref = _supcon_loss_ref(features, labels, target_labels)
    assert jnp.allclose(out, ref, atol=1e-3, rtol=1e-3), (out, ref)

    print("KERNEL_OK")
</pallas_src>

<mosaic_0001>
module attributes {stable_mosaic.version = 11 : i64} {
  func.func @_supcon_kernel(%arg0: i32, %arg1: memref<128x128xbf16, #tpu.memory_space<vmem>>, %arg2: memref<128x128xbf16, #tpu.memory_space<vmem>>, %arg3: memref<128x1xi32, #tpu.memory_space<vmem>>, %arg4: memref<1x128xi32, #tpu.memory_space<vmem>>, %arg5: memref<128x1xf32, #tpu.memory_space<vmem>>, %arg6: memref<128x1xf32, #tpu.memory_space<vmem>>) attributes {dimension_semantics = [#tpu.dimension_semantics<parallel>], iteration_bounds = array<i64: 1>, scalar_prefetch = 0 : i64, scratch_operands = 0 : i64, tpu.core_type = #tpu.core_type<tc>, window_params = [{transform_indices = @transform_0, window_bounds = array<i64: 128, 128>}, {pipeline_mode = #tpu.pipeline_mode<synchronous>, transform_indices = @transform_1, window_bounds = array<i64: 128, 128>}, {transform_indices = @transform_2, window_bounds = array<i64: 128, 1>}, {pipeline_mode = #tpu.pipeline_mode<synchronous>, transform_indices = @transform_3, window_bounds = array<i64: 1, 128>}, {transform_indices = @transform_4, window_bounds = array<i64: 128, 1>}, {transform_indices = @transform_5, window_bounds = array<i64: 128, 1>}]} {
    %c0 = arith.constant 0 : index
    %c0_0 = arith.constant 0 : index
    %0 = vector.load %arg1[%c0, %c0_0] : memref<128x128xbf16, #tpu.memory_space<vmem>>, vector<128x128xbf16>
    %c0_1 = arith.constant 0 : index
    %c0_2 = arith.constant 0 : index
    %1 = vector.load %arg2[%c0_1, %c0_2] : memref<128x128xbf16, #tpu.memory_space<vmem>>, vector<128x128xbf16>
    %cst = arith.constant dense<0.000000e+00> : vector<128x128xf32>
    %2 = tpu.matmul %0, %1, %cst {dimension_numbers = #tpu.dot_dimension_numbers<[1], [1], [0], [0], [0, 0, 1, 0], [], []>} : vector<128x128xbf16>, vector<128x128xbf16>, vector<128x128xf32> -> vector<128x128xf32>
    %cst_3 = arith.constant 14.2857141 : f32
    %3 = vector.broadcast %cst_3 : f32 to vector<128x128xf32>
    %4 = arith.mulf %2, %3 : vector<128x128xf32>
    %cst_4 = arith.constant dense<0xFF800000> : vector<128xf32>
    %5 = vector.multi_reduction <maximumf>, %4, %cst_4 [1] : vector<128x128xf32> to vector<128xf32>
    %6 = vector.shape_cast %5 : vector<128xf32> to vector<128x1xf32>
    %7 = vector.broadcast %6 : vector<128x1xf32> to vector<128x128xf32>
    %8 = arith.subf %4, %7 : vector<128x128xf32>
    %c128_i32 = arith.constant 128 : i32
    %9 = arith.muli %arg0, %c128_i32 : i32
    %10 = tpu.iota {dimensions = array<i32: 0>} : vector<128x1xi32>
    %11 = vector.broadcast %9 : i32 to vector<128x1xi32>
    %12 = arith.addi %11, %10 : vector<128x1xi32>
    %13 = tpu.iota {dimensions = array<i32: 1>} : vector<1x128xi32>
    %c0_5 = arith.constant 0 : index
    %c0_6 = arith.constant 0 : index
    %14 = vector.load %arg4[%c0_5, %c0_6] : memref<1x128xi32, #tpu.memory_space<vmem>>, vector<1x128xi32>
    %15 = vector.broadcast %12 : vector<128x1xi32> to vector<128x128xi32>
    %16 = vector.broadcast %13 : vector<1x128xi32> to vector<128x128xi32>
    %17 = arith.cmpi ne, %15, %16 : vector<128x128xi32>
    %c0_i32 = arith.constant 0 : i32
    %18 = vector.broadcast %c0_i32 : i32 to vector<1x128xi32>
    %19 = arith.cmpi sge, %14, %18 : vector<1x128xi32>
    %20 = vector.broadcast %19 : vector<1x128xi1> to vector<128x128xi1>
    %21 = arith.andi %17, %20 : vector<128x128xi1>
    %c0_7 = arith.constant 0 : index
    %c0_8 = arith.constant 0 : index
    %22 = vector.load %arg3[%c0_7, %c0_8] : memref<128x1xi32, #tpu.memory_space<vmem>>, vector<128x1xi32>
    %23 = vector.broadcast %22 : vector<128x1xi32> to vector<128x128xi32>
    %24 = vector.broadcast %14 : vector<1x128xi32> to vector<128x128xi32>
    %25 = arith.cmpi eq, %23, %24 : vector<128x128xi32>
    %26 = arith.andi %25, %21 : vector<128x128xi1>
    %27 = math.exp %8 : vector<128x128xf32>
    %cst_9 = arith.constant 0.000000e+00 : f32
    %28 = vector.broadcast %cst_9 : f32 to vector<128x128xf32>
    %29 = arith.select %21, %27, %28 : vector<128x128xi1>, vector<128x128xf32>
    %cst_10 = arith.constant dense<0.000000e+00> : vector<128xf32>
    %30 = vector.multi_reduction <add>, %29, %cst_10 [1] : vector<128x128xf32> to vector<128xf32>
    %31 = vector.shape_cast %30 : vector<128xf32> to vector<128x1xf32>
    %32 = math.log %31 : vector<128x1xf32>
    %cst_11 = arith.constant 1.000000e+00 : f32
    %cst_12 = arith.constant 0.000000e+00 : f32
    %33 = vector.broadcast %cst_11 : f32 to vector<128x128xf32>
    %34 = vector.broadcast %cst_12 : f32 to vector<128x128xf32>
    %35 = arith.select %26, %33, %34 : vector<128x128xi1>, vector<128x128xf32>
    %cst_13 = arith.constant dense<0.000000e+00> : vector<128xf32>
    %36 = vector.multi_reduction <add>, %35, %cst_13 [1] : vector<128x128xf32> to vector<128xf32>
    %37 = vector.shape_cast %36 : vector<128xf32> to vector<128x1xf32>
    %cst_14 = arith.constant 0.000000e+00 : f32
    %38 = vector.broadcast %cst_14 : f32 to vector<128x128xf32>
    %39 = arith.select %26, %8, %38 : vector<128x128xi1>, vector<128x128xf32>
    %cst_15 = arith.constant dense<0.000000e+00> : vector<128xf32>
    %40 = vector.multi_reduction <add>, %39, %cst_15 [1] : vector<128x128xf32> to vector<128xf32>
    %41 = vector.shape_cast %40 : vector<128xf32> to vector<128x1xf32>
    %42 = arith.mulf %37, %32 : vector<128x1xf32>
    %43 = arith.subf %41, %42 : vector<128x1xf32>
    %cst_16 = arith.constant 1.000000e+00 : f32
    %44 = vector.broadcast %cst_16 : f32 to vector<128x1xf32>
    %45 = arith.maximumf %37, %44 : vector<128x1xf32>
    %46 = arith.divf %43, %45 : vector<128x1xf32>
    %c0_17 = arith.constant 0 : index
    %c0_18 = arith.constant 0 : index
    %47 = vector.load %arg5[%c0_17, %c0_18] : memref<128x1xf32, #tpu.memory_space<vmem>>, vector<128x1xf32>
    %48 = arith.mulf %46, %47 : vector<128x1xf32>
    %c0_19 = arith.constant 0 : index
    %c0_20 = arith.constant 0 : index
    %49 = vector.load %arg6[%c0_19, %c0_20] : memref<128x1xf32, #tpu.memory_space<vmem>>, vector<128x1xf32>
    tpu.vector_store %arg6[%c0_19, %c0_20], %48 {strides = array<i32>} : memref<128x1xf32, #tpu.memory_space<vmem>>, vector<128x1xf32>,
    return
  }
  func.func @transform_0(%arg0: i32) -> (i32, i32) {
    %c0_i32 = arith.constant 0 : i32
    %c0_i32_0 = arith.constant 0 : i32
    return %arg0, %c0_i32 : i32, i32
  }
  func.func @transform_1(%arg0: i32) -> (i32, i32) {
    %c0_i32 = arith.constant 0 : i32
    %c0_i32_0 = arith.constant 0 : i32
    %c0_i32_1 = arith.constant 0 : i32
    return %c0_i32, %c0_i32_0 : i32, i32
  }
  func.func @transform_2(%arg0: i32) -> (i32, i32) {
    %c0_i32 = arith.constant 0 : i32
    %c0_i32_0 = arith.constant 0 : i32
    return %arg0, %c0_i32 : i32, i32
  }
  func.func @transform_3(%arg0: i32) -> (i32, i32) {
    %c0_i32 = arith.constant 0 : i32
    %c0_i32_0 = arith.constant 0 : i32
    %c0_i32_1 = arith.constant 0 : i32
    return %c0_i32, %c0_i32_0 : i32, i32
  }
  func.func @transform_4(%arg0: i32) -> (i32, i32) {
    %c0_i32 = arith.constant 0 : i32
    %c0_i32_0 = arith.constant 0 : i32
    return %arg0, %c0_i32 : i32, i32
  }
  func.func @transform_5(%arg0: i32) -> (i32, i32) {
    %c0_i32 = arith.constant 0 : i32
    %c0_i32_0 = arith.constant 0 : i32
    return %arg0, %c0_i32 : i32, i32
  }
}

module attributes {stable_mosaic.version = 11 : i64} {
  func.func @_supcon_kernel(%arg0: i32, %arg1: memref<128x128xbf16, #tpu.memory_space<vmem>>, %arg2: memref<128x128xbf16, #tpu.memory_space<vmem>>, %arg3: memref<128x1xi32, #tpu.memory_space<vmem>>, %arg4: memref<1x128xi32, #tpu.memory_space<vmem>>, %arg5: memref<128x1xf32, #tpu.memory_space<vmem>>, %arg6: memref<128x1xf32, #tpu.memory_space<vmem>>) attributes {dimension_semantics = [#tpu.dimension_semantics<parallel>], iteration_bounds = array<i64: 1>, scalar_prefetch = 0 : i64, scratch_operands = 0 : i64, tpu.core_type = #tpu.core_type<tc>, window_params = [{transform_indices = @transform_0, window_bounds = array<i64: 128, 128>}, {pipeline_mode = #tpu.pipeline_mode<synchronous>, transform_indices = @transform_1, window_bounds = array<i64: 128, 128>}, {transform_indices = @transform_2, window_bounds = array<i64: 128, 1>}, {pipeline_mode = #tpu.pipeline_mode<synchronous>, transform_indices = @transform_3, window_bounds = array<i64: 1, 128>}, {transform_indices = @transform_4, window_bounds = array<i64: 128, 1>}, {transform_indices = @transform_5, window_bounds = array<i64: 128, 1>}]} {
    %c0 = arith.constant 0 : index
    %c0_0 = arith.constant 0 : index
    %0 = vector.load %arg1[%c0, %c0_0] : memref<128x128xbf16, #tpu.memory_space<vmem>>, vector<128x128xbf16>
    %c0_1 = arith.constant 0 : index
    %c0_2 = arith.constant 0 : index
    %1 = vector.load %arg2[%c0_1, %c0_2] : memref<128x128xbf16, #tpu.memory_space<vmem>>, vector<128x128xbf16>
    %cst = arith.constant dense<0.000000e+00> : vector<128x128xf32>
    %2 = tpu.matmul %0, %1, %cst {dimension_numbers = #tpu.dot_dimension_numbers<[1], [1], [0], [0], [0, 0, 1, 0], [], []>} : vector<128x128xbf16>, vector<128x128xbf16>, vector<128x128xf32> -> vector<128x128xf32>
    %cst_3 = arith.constant 14.2857141 : f32
    %3 = vector.broadcast %cst_3 : f32 to vector<128x128xf32>
    %4 = arith.mulf %2, %3 : vector<128x128xf32>
    %cst_4 = arith.constant dense<0xFF800000> : vector<128xf32>
    %5 = vector.multi_reduction <maximumf>, %4, %cst_4 [1] : vector<128x128xf32> to vector<128xf32>
    %6 = vector.shape_cast %5 : vector<128xf32> to vector<128x1xf32>
    %7 = vector.broadcast %6 : vector<128x1xf32> to vector<128x128xf32>
    %8 = arith.subf %4, %7 : vector<128x128xf32>
    %c128_i32 = arith.constant 128 : i32
    %9 = arith.muli %arg0, %c128_i32 : i32
    %10 = tpu.iota {dimensions = array<i32: 0>} : vector<128x1xi32>
    %11 = vector.broadcast %9 : i32 to vector<128x1xi32>
    %12 = arith.addi %11, %10 : vector<128x1xi32>
    %13 = tpu.iota {dimensions = array<i32: 1>} : vector<1x128xi32>
    %c0_5 = arith.constant 0 : index
    %c0_6 = arith.constant 0 : index
    %14 = vector.load %arg4[%c0_5, %c0_6] : memref<1x128xi32, #tpu.memory_space<vmem>>, vector<1x128xi32>
    %15 = vector.broadcast %12 : vector<128x1xi32> to vector<128x128xi32>
    %16 = vector.broadcast %13 : vector<1x128xi32> to vector<128x128xi32>
    %17 = arith.cmpi ne, %15, %16 : vector<128x128xi32>
    %c0_i32 = arith.constant 0 : i32
    %18 = vector.broadcast %c0_i32 : i32 to vector<1x128xi32>
    %19 = arith.cmpi sge, %14, %18 : vector<1x128xi32>
    %20 = vector.broadcast %19 : vector<1x128xi1> to vector<128x128xi1>
    %21 = arith.andi %17, %20 : vector<128x128xi1>
    %c0_7 = arith.constant 0 : index
    %c0_8 = arith.constant 0 : index
    %22 = vector.load %arg3[%c0_7, %c0_8] : memref<128x1xi32, #tpu.memory_space<vmem>>, vector<128x1xi32>
    %23 = vector.broadcast %22 : vector<128x1xi32> to vector<128x128xi32>
    %24 = vector.broadcast %14 : vector<1x128xi32> to vector<128x128xi32>
    %25 = arith.cmpi eq, %23, %24 : vector<128x128xi32>
    %26 = arith.andi %25, %21 : vector<128x128xi1>
    %27 = math.exp %8 : vector<128x128xf32>
    %cst_9 = arith.constant 0.000000e+00 : f32
    %28 = vector.broadcast %cst_9 : f32 to vector<128x128xf32>
    %29 = arith.select %21, %27, %28 : vector<128x128xi1>, vector<128x128xf32>
    %cst_10 = arith.constant dense<0.000000e+00> : vector<128xf32>
    %30 = vector.multi_reduction <add>, %29, %cst_10 [1] : vector<128x128xf32> to vector<128xf32>
    %31 = vector.shape_cast %30 : vector<128xf32> to vector<128x1xf32>
    %32 = math.log %31 : vector<128x1xf32>
    %cst_11 = arith.constant 1.000000e+00 : f32
    %cst_12 = arith.constant 0.000000e+00 : f32
    %33 = vector.broadcast %cst_11 : f32 to vector<128x128xf32>
    %34 = vector.broadcast %cst_12 : f32 to vector<128x128xf32>
    %35 = arith.select %26, %33, %34 : vector<128x128xi1>, vector<128x128xf32>
    %cst_13 = arith.constant dense<0.000000e+00> : vector<128xf32>
    %36 = vector.multi_reduction <add>, %35, %cst_13 [1] : vector<128x128xf32> to vector<128xf32>
    %37 = vector.shape_cast %36 : vector<128xf32> to vector<128x1xf32>
    %cst_14 = arith.constant 0.000000e+00 : f32
    %38 = vector.broadcast %cst_14 : f32 to vector<128x128xf32>
    %39 = arith.select %26, %8, %38 : vector<128x128xi1>, vector<128x128xf32>
    %cst_15 = arith.constant dense<0.000000e+00> : vector<128xf32>
    %40 = vector.multi_reduction <add>, %39, %cst_15 [1] : vector<128x128xf32> to vector<128xf32>
    %41 = vector.shape_cast %40 : vector<128xf32> to vector<128x1xf32>
    %42 = arith.mulf %37, %32 : vector<128x1xf32>
    %43 = arith.subf %41, %42 : vector<128x1xf32>
    %cst_16 = arith.constant 1.000000e+00 : f32
    %44 = vector.broadcast %cst_16 : f32 to vector<128x1xf32>
    %45 = arith.maximumf %37, %44 : vector<128x1xf32>
    %46 = arith.divf %43, %45 : vector<128x1xf32>
    %c0_17 = arith.constant 0 : index
    %c0_18 = arith.constant 0 : index
    %47 = vector.load %arg5[%c0_17, %c0_18] : memref<128x1xf32, #tpu.memory_space<vmem>>, vector<128x1xf32>
    %48 = arith.mulf %46, %47 : vector<128x1xf32>
    %c0_19 = arith.constant 0 : index
    %c0_20 = arith.constant 0 : index
    %49 = vector.load %arg6[%c0_19, %c0_20] : memref<128x1xf32, #tpu.memory_space<vmem>>, vector<128x1xf32>
    tpu.vector_store %arg6[%c0_19, %c0_20], %48 {strides = array<i32>} : memref<128x1xf32, #tpu.memory_space<vmem>>, vector<128x1xf32>,
    return
  }
  func.func @transform_0(%arg0: i32) -> (i32, i32) {
    %c0_i32 = arith.constant 0 : i32
    %c0_i32_0 = arith.constant 0 : i32
    return %arg0, %c0_i32 : i32, i32
  }
  func.func @transform_1(%arg0: i32) -> (i32, i32) {
    %c0_i32 = arith.constant 0 : i32
    %c0_i32_0 = arith.constant 0 : i32
    %c0_i32_1 = arith.constant 0 : i32
    return %c0_i32, %c0_i32_0 : i32, i32
  }
  func.func @transform_2(%arg0: i32) -> (i32, i32) {
    %c0_i32 = arith.constant 0 : i32
    %c0_i32_0 = arith.constant 0 : i32
    return %arg0, %c0_i32 : i32, i32
  }
  func.func @transform_3(%arg0: i32) -> (i32, i32) {
    %c0_i32 = arith.constant 0 : i32
    %c0_i32_0 = arith.constant 0 : i32
    %c0_i32_1 = arith.constant 0 : i32
    return %c0_i32, %c0_i32_0 : i32, i32
  }
  func.func @transform_4(%arg0: i32) -> (i32, i32) {
    %c0_i32 = arith.constant 0 : i32
    %c0_i32_0 = arith.constant 0 : i32
    return %arg0, %c0_i32 : i32, i32
  }
  func.func @transform_5(%arg0: i32) -> (i32, i32) {
    %c0_i32 = arith.constant 0 : i32
    %c0_i32_0 = arith.constant 0 : i32
    return %arg0, %c0_i32 : i32, i32
  }
}

</mosaic_0001>

<bundles_post_ra>
// kernel: tpu_custom_call.1
= control target key start
LH: loop header
LB: loop body
LE: loop exit
PB: predicated region body
PF: predicated region fallthrough
CT: control target
= control target key end

     0   :  { %v1024_v1 = vmov 0   ;;  %s1819_s1 = inlined_call_operand.vmem [shape: bf16[128,128], index: 1, kind: input, shape index: {}]   ;;  %s1820_s0 = inlined_call_operand.vmem [shape: bf16[128,128], index: 0, kind: input, shape index: {}]   ;;  %s1821_s2 = inlined_call_operand.vmem [shape: s32[128,1], index: 2, kind: input, shape index: {}]   ;;  %s1822_s3 = inlined_call_operand.vmem [shape: s32[1,128], index: 3, kind: input, shape index: {}]   ;;  %s1823_s4 = inlined_call_operand.vmem [shape: f32[128,1], index: 4, kind: input, shape index: {}]   ;;  %s1824_s5 = inlined_call_operand.vmem [shape: f32[128,1], index: 5, kind: output, shape index: {}]  }
   0x1   :  { %v912_v0 = vld [vmem:[%s1819_s1] sm:$0xff]   ;;  %911 = vset.pattern.permute.xlu1 %v1024_v1  ;;  %910 = vset.pattern.permute.xlu0 %v1024_v1  ;;  %v913_v2 = vld [vmem:[%s1819_s1 + $0x8] sm:$0xff]   ;;  %v914_v3 = vld [vmem:[%s1819_s1 + $0x10] sm:$0xff]  }
   0x2   :  { %860 = vmatprep.subr.bf16.mxu0 %v912_v0  ;;  %892 = vmatprep.subr.bf16.mxu1 %v912_v0  ;;  %v920_v4 = vld [vmem:[%s1820_s0] sm:$0xff]   ;;  %v915_v6 = vld [vmem:[%s1819_s1 + $0x18] sm:$0xff]   ;;  %v388_v7 = vld [vmem:[%s1821_s2 + $0x8] sm:$0xff] }
   0x3   :  { %861 = vmatpush3.bf16.xpose.msra.mxu0 %v912_v0  ;;  %900 = vmatpush3.bf16.xpose.msra.mxu1 %v912_v0  ;;  %v921_v5 = vld [vmem:[%s1820_s0 + $0x20] sm:$0xff]   ;;  %v389_v8 = vld [vmem:[%s1821_s2 + $0x10] sm:$0xff]  ;;  %v390_v10 = vld [vmem:[%s1821_s2 + $0x18] sm:$0xff] }
   0x4   :  { %862 = vmatprep.subr.bf16.mxu0 %v913_v2  ;;  %893 = vmatprep.subr.bf16.mxu1 %v913_v2  ;;  %v387_v9 = vld [vmem:[%s1821_s2] sm:$0xff]  ;;  %v396_v11 = vld [vmem:[%s1821_s2 + $0x48] sm:$0xff]  ;;  %v398_v14 = vld [vmem:[%s1821_s2 + $0x58] sm:$0xff] }
   0x5   :  { %876 = vmatprep.mubr.bf16.mxu0 %v920_v4  ;;  %884 = vmatprep.mubr.bf16.mxu1 %v921_v5  ;;  %v916_v12 = vld [vmem:[%s1819_s1 + $0x20] sm:$0xff]   ;;  %v392_v15 = vld [vmem:[%s1821_s2 + $0x28] sm:$0xff]  ;;  %v393_v18 = vld [vmem:[%s1821_s2 + $0x30] sm:$0xff]  ;;  %v311_v5 = vlaneseq }
   0x6   :  { %407 = vperm.xlu1 %911, %v388_v7   ;;  %404 = vperm.xlu0 %910, %v387_v9   ;;  %v391_v13 = vld [vmem:[%s1821_s2 + $0x20] sm:$0xff]  ;;  %v400_v16 = vld [vmem:[%s1821_s2 + $0x68] sm:$0xff]  ;;  %v394_v19 = vld [vmem:[%s1821_s2 + $0x38] sm:$0xff] }
   0x7   :  { %v917_v17 = vld [vmem:[%s1819_s1 + $0x28] sm:$0xff]   ;;  %v918_v20 = vld [vmem:[%s1819_s1 + $0x30] sm:$0xff]   ;;  %v395_v21 = vld [vmem:[%s1821_s2 + $0x40] sm:$0xff] }
   0x8   :  { %v397_v22 = vld [vmem:[%s1821_s2 + $0x50] sm:$0xff]  ;;  %v919_v23 = vld [vmem:[%s1819_s1 + $0x38] sm:$0xff]   ;;  %v399_v24 = vld [vmem:[%s1821_s2 + $0x60] sm:$0xff] }
   0x9   :  { %v922_v25 = vld [vmem:[%s1820_s0 + $0x8] sm:$0xff]   ;;  %v924_v27 = vld [vmem:[%s1820_s0 + $0x10] sm:$0xff]   ;;  %v925_v29 = vld [vmem:[%s1820_s0 + $0x18] sm:$0xff]  }
   0xa   :  { %410 = vperm.xlu1 %911, %v389_v8   ;;  %431 = vperm.xlu0 %910, %v396_v11   ;;  %v923_v26 = vld [vmem:[%s1820_s0 + $0x28] sm:$0xff]   ;;  %v926_v28 = vld [vmem:[%s1820_s0 + $0x30] sm:$0xff]   ;;  %v927_v30 = vld [vmem:[%s1820_s0 + $0x38] sm:$0xff]   ;;  %v1205_v8 = vshrl.u32 %v311_v5, 7 }
   0xb   :  { %863 = vmatpush3.bf16.xpose.msra.mxu0 %v913_v2  ;;  %901 = vmatpush3.bf16.xpose.msra.mxu1 %v913_v2  ;;  %v401_v0 = vld [vmem:[%s1821_s2 + $0x70] sm:$0xff] }
   0xc   :  { %864 = vmatprep.subr.bf16.mxu0 %v914_v3  ;;  %894 = vmatprep.subr.bf16.mxu1 %v914_v3  ;;  %v368_v9 = vsub.s32 0, %v1205_v8 }
   0xe   :  { %413 = vperm.xlu1 %911, %v390_v10   ;;  %437 = vperm.xlu0 %910, %v398_v14   ;;  %v313_v14 = vadd.s32 8, %v1205_v8 }
  0x12   :  { %416 = vperm.xlu1 %911, %v391_v13   ;;  %443 = vperm.xlu0 %910, %v400_v16   ;;  %v1211_v13 = vand.u32 127, %v311_v5 }
  0x13   :  { %865 = vmatpush3.bf16.xpose.msra.mxu0 %v914_v3  ;;  %902 = vmatpush3.bf16.xpose.msra.mxu1 %v914_v3  ;;  %v402_v3 = vld [vmem:[%s1821_s2 + $0x78] sm:$0xff] }
  0x14   :  { %866 = vmatprep.subr.bf16.mxu0 %v915_v6  ;;  %895 = vmatprep.subr.bf16.mxu1 %v915_v6  ;;  %vm348_vm1 = vcmp.ne.s32.totalorder %v1205_v8, %v1211_v13  ;;  %vm349_vm3 = vcmp.ne.s32.totalorder %v313_v14, %v1211_v13  ;;  %v1890_v14 = vmov 0 }
  0x16   :  { %419 = vperm.xlu1 %911, %v392_v15   ;;  %v314_v15 = vadd.s32 16, %v1205_v8 }
  0x18   :  { %vm350_vm6 = vcmp.ne.s32.totalorder %v314_v15, %v1211_v13  ;;  %v325_v15 = vadd.s32 104, %v1205_v8 }
  0x1a   :  { %422 = vperm.xlu1 %911, %v393_v18  }
  0x1b   :  { %867 = vmatpush3.bf16.xpose.msra.mxu0 %v915_v6  ;;  %903 = vmatpush3.bf16.xpose.msra.mxu1 %v915_v6  ;;  %v347_v6 = vld [vmem:[%s1822_s3] sm:$0x1] }
  0x1c   :  { %868 = vmatprep.subr.bf16.mxu0 %v916_v12  ;;  %896 = vmatprep.subr.bf16.mxu1 %v916_v12  ;;  %vm364_vm0 = vcmp.ge.s32.totalorder %v347_v6, 0  ;;  %v1217_v16 = vrot.slane %v347_v6, %v368_v9  ;;  %v1884_v6 = vmov 0 }
  0x1d   :  { %v365_v10 = vsel %vm364_vm0, 1, %v1024_v1  ;;  %v315_v1 = vadd.s32 24, %v1205_v8 }
  0x1e   :  { %425 = vperm.xlu1 %911, %v394_v19   ;;  %v1854_v19 = vmov 0 }
  0x1f   :  { %vm351_vm10 = vcmp.ne.s32.totalorder %v315_v1, %v1211_v13 }
  0x22   :  { %428 = vperm.xlu1 %911, %v395_v21   ;;  %v1856_v21 = vmov 0 }
  0x23   :  { %869 = vmatpush3.bf16.xpose.msra.mxu0 %v916_v12  ;;  %904 = vmatpush3.bf16.xpose.msra.mxu1 %v916_v12  ;;  %v1209_v12 = vrot.slane %v365_v10, %v368_v9  ;;  %v1886_v9 = vmov 0  ;;  %v324_v10 = vadd.s32 96, %v1205_v8 }
  0x24   :  { %870 = vmatprep.subr.bf16.mxu0 %v917_v17  ;;  %897 = vmatprep.subr.bf16.mxu1 %v917_v17 }
  0x25   :  { %vm370_vm2 = vcmp.eq.s32.totalorder %v1209_v12, 1 }
  0x26   :  { %434 = vperm.xlu1 %911, %v397_v22   ;;  %vm1225_vm5 = vmand %vm348_vm1, %vm370_vm2 }
  0x27   :  { %v1855_v19 = vsel %vm1225_vm5, 4294967295, %v1854_v19  ;;  %vm1234_vm8 = vmand %vm349_vm3, %vm370_vm2 }
  0x28   :  { %v1857_v21 = vsel %vm1234_vm8, 4294967295, %v1856_v21  ;;  %vm1249_vm12 = vmand %vm350_vm6, %vm370_vm2 }
  0x29   :  { %vm1267_vm0 = vmand %vm351_vm10, %vm370_vm2 }
  0x2a   :  { %440 = vperm.xlu1 %911, %v399_v24  }
  0x2b   :  { %871 = vmatpush3.bf16.xpose.msra.mxu0 %v917_v17  ;;  %905 = vmatpush3.bf16.xpose.msra.mxu1 %v917_v17 }
  0x2c   :  { %872 = vmatprep.subr.bf16.mxu0 %v918_v20  ;;  %898 = vmatprep.subr.bf16.mxu1 %v918_v20 }
  0x33   :  { %873 = vmatpush3.bf16.xpose.msra.mxu0 %v918_v20  ;;  %906 = vmatpush3.bf16.xpose.msra.mxu1 %v918_v20  ;;  %v316_v20 = vadd.s32 32, %v1205_v8 }
  0x34   :  { %874 = vmatprep.subr.bf16.mxu0 %v919_v23  ;;  %899 = vmatprep.subr.bf16.mxu1 %v919_v23 }
  0x35   :  { %vm352_vm14 = vcmp.ne.s32.totalorder %v316_v20, %v1211_v13  ;;  %v1895_v20 = vmov 0 }
  0x36   :  { %vm1285_vm6 = vmand %vm352_vm14, %vm370_vm2 }
  0x3b   :  { %875 = vmatpush3.bf16.xpose.msra.mxu0 %v919_v23  ;;  %907 = vmatpush3.bf16.xpose.msra.mxu1 %v919_v23  ;;  %v317_v23 = vadd.s32 40, %v1205_v8 }
  0x3d   :  { %vm353_vm3 = vcmp.ne.s32.totalorder %v317_v23, %v1211_v13 }
  0x3e   :  { %vm1300_vm14 = vmand %vm353_vm3, %vm370_vm2 }
  0x42   :  { %877 = vmatmul.mubr.bf16.vlgmr.msra.gmra.mrb[0].mxu0 %v922_v25  ;;  %885 = vmatmul.mubr.bf16.vlgmr.msra.gmra.mrb[0].mxu1 %v923_v26  ;;  %v1860_v25 = vmov 0 }
  0x43   :  { %880 = vmatprep.mubr.bf16.mxu0 %v924_v27  ;;  %888 = vmatprep.mubr.bf16.mxu1 %v926_v28  ;;  %v1861_v25 = vsel %vm1249_vm12, 4294967295, %v1860_v25  ;;  %v318_v27 = vadd.s32 48, %v1205_v8  ;;  %v1842_v28 = vmov 0.0  }
  0x45   :  { %vm354_vm10 = vcmp.ne.s32.totalorder %v318_v27, %v1211_v13 }
  0x46   :  { %vm1321_vm3 = vmand %vm354_vm10, %vm370_vm2 }
  0x4a   :  { %881 = vmatmul.mubr.bf16.gmra.mrb[4].mxu0 %v925_v29  ;;  %889 = vmatmul.mubr.bf16.gmra.mrb[4].mxu1 %v927_v30  ;;  %v1864_v30 = vmov 0 }
  0x4b   :  { %v1865_v30 = vsel %vm1267_vm0, 4294967295, %v1864_v30 }
  0x85   :  { %v408_v63 = vpop.permute.xlu1 %407  ;;  %v405_v18 = vpop.permute.xlu0 %404 }
  0x86   :  { %vm455_vm4 = vcmp.eq.s32.totalorder %v405_v18, %v1217_v16  ;;  %vm456_vm7 = vcmp.eq.s32.totalorder %v408_v63, %v1217_v16  ;;  %v1880_v63 = vmov 0 }
  0x87   :  { %vm1240_vm9 = vmand %vm455_vm4, %vm1225_vm5 }
  0x88   :  { %vm1255_vm13 = vmand %vm456_vm7, %vm1234_vm8  ;;  %v599_v29 = vsel %vm1240_vm9, 1.0, %v1842_v28 }
  0x89   :  { %v411_v2 = vpop.permute.xlu1 %410 }
  0x8a   :  { %vm457_vm11 = vcmp.eq.s32.totalorder %v411_v2, %v1217_v16  ;;  %v323_v2 = vadd.s32 88, %v1205_v8 }
  0x8b   :  { %vm1273_vm1 = vmand %vm457_vm11, %vm1249_vm12 }
  0x8d   :  { %v414_v4 = vpop.permute.xlu1 %413 }
  0x8e   :  { %vm458_vm15 = vcmp.eq.s32.totalorder %v414_v4, %v1217_v16 }
  0x8f   :  { %vm1291_vm7 = vmand %vm458_vm15, %vm1267_vm0 }
  0x91   :  { %v417_v7 = vpop.permute.xlu1 %416 }
  0x92   :  { %vm459_vm4 = vcmp.eq.s32.totalorder %v417_v7, %v1217_v16 }
  0x93   :  { %vm1306_vm15 = vmand %vm459_vm4, %vm1285_vm6 }
  0x94   :  { %v603_v4 = vsel %vm1306_vm15, 1.0, %v1842_v28 }
  0x95   :  { %v420_v11 = vpop.permute.xlu1 %419 }
  0x96   :  { %vm460_vm11 = vcmp.eq.s32.totalorder %v420_v11, %v1217_v16  ;;  %v1888_v11 = vmov 0 }
  0x97   :  { %vm1327_vm4 = vmand %vm460_vm11, %vm1300_vm14 }
  0x98   :  { %v604_v5 = vsel %vm1327_vm4, 1.0, %v1842_v28 }
  0x99   :  { %v423_v17 = vpop.permute.xlu1 %422 }
  0x9a   :  { %vm461_vm0 = vcmp.eq.s32.totalorder %v423_v17, %v1217_v16 }
  0x9b   :  { %vm1342_vm12 = vmand %vm461_vm0, %vm1321_vm3 }
  0x9c   :  { %v605_v17 = vsel %vm1342_vm12, 1.0, %v1842_v28 }
  0x9d   :  { %v426_v24 = vpop.permute.xlu1 %425 }
  0x9e   :  { %vm462_vm5 = vcmp.eq.s32.totalorder %v426_v24, %v1217_v16 }
 0x115   :  { %v878_v31 = vpop.f32.mrb[0].mxu0  ;;  %v886_v32 = vpop.f32.mrb[0].mxu1 }
 0x116   :  { %v1148_v33 = vmul.f32 14.285714, %v878_v31  ;;  %v1150_v34 = vmul.f32 14.285714, %v886_v32  ;;  %v183_v35 = vpop.f32.mrb[1].mxu0  ;;  %v215_v36 = vpop.f32.mrb[1].mxu1 }
 0x117   :  { %v879_v37 = vpop.f32.mrb[2].mxu0  ;;  %v887_v38 = vpop.f32.mrb[2].mxu1  ;;  %v1152_v39 = vmul.f32 14.285714, %v183_v35  ;;  %v1160_v45 = vmul.f32 14.285714, %v215_v36 }
 0x118   :  { %v1154_v40 = vmul.f32 14.285714, %v879_v37  ;;  %282 = vmax.xlane.f32.xlu0 %v1150_v34  ;;  %v218_v41 = vpop.f32.mrb[3].mxu1  ;;  %266 = vmax.xlane.f32.xlu1 %v1148_v33  ;;  %v186_v42 = vpop.f32.mrb[3].mxu0  ;;  %v1162_v46 = vmul.f32 14.285714, %v887_v38 }
 0x119   :  { %v1166_v53 = vmul.f32 14.285714, %v218_v41  ;;  %v1168_v54 = vmul.f32 14.285714, %v186_v42  ;;  %v319_v32 = vadd.s32 56, %v1205_v8  ;;  %v600_v35 = vsel %vm1255_vm13, 1.0, %v1842_v28  ;;  %v429_v41 = vpop.permute.xlu1 %428 }
 0x11a   :  { %v1868_v36 = vmov 0  ;;  %v320_v38 = vadd.s32 64, %v1205_v8  ;;  %v1872_v42 = vmov 0 }
 0x11b   :  { %v1869_v36 = vsel %vm1285_vm6, 4294967295, %v1868_v36  ;;  %v1873_v42 = vsel %vm1300_vm14, 4294967295, %v1872_v42  ;;  %vm355_vm8 = vcmp.ne.s32.totalorder %v319_v32, %v1211_v13  ;;  %vm463_vm14 = vcmp.eq.s32.totalorder %v429_v41, %v1217_v16 }
 0x11c   :  { %262 = vmax.xlane.f32.xlu0 %v1152_v39  ;;  %268 = vmax.xlane.f32.xlu1 %v1154_v40  ;;  %vm356_vm6 = vcmp.ne.s32.totalorder %v320_v38, %v1211_v13  ;;  %vm1336_vm10 = vmand %vm355_vm8, %vm370_vm2  ;;  %v1903_v38 = vmov 0  ;;  %v1906_v41 = vmov 0 }
 0x11d   :  { %v882_v43 = vpop.f32.mrb[4].mxu0  ;;  %v890_v44 = vpop.f32.mrb[4].mxu1  ;;  %v1881_v63 = vsel %vm1336_vm10, 4294967295, %v1880_v63  ;;  %vm1357_vm8 = vmand %vm356_vm6, %vm370_vm2 }
 0x11e   :  { %v199_v47 = vpop.f32.mrb[5].mxu0  ;;  %v231_v48 = vpop.f32.mrb[5].mxu1  ;;  %v1170_v55 = vmul.f32 14.285714, %v882_v43  ;;  %v1176_v57 = vmul.f32 14.285714, %v890_v44  ;;  %vm1363_vm0 = vmand %vm462_vm5, %vm1336_vm10  ;;  %vm359_vm5 = vcmp.ne.s32.totalorder %v323_v2, %v1211_v13 }
 0x11f   :  { %v883_v49 = vpop.f32.mrb[6].mxu0  ;;  %v891_v50 = vpop.f32.mrb[6].mxu1  ;;  %v1184_v59 = vmul.f32 14.285714, %v199_v47  ;;  %v1190_v61 = vmul.f32 14.285714, %v231_v48 }
 0x120   :  { %278 = vmax.xlane.f32.xlu0 %v1160_v45  ;;  %284 = vmax.xlane.f32.xlu1 %v1162_v46  ;;  %v202_v51 = vpop.f32.mrb[7].mxu0  ;;  %v234_v52 = vpop.f32.mrb[7].mxu1  ;;  %v1174_v56 = vmul.f32 14.285714, %v883_v49  ;;  %v1178_v58 = vmul.f32 14.285714, %v891_v50 }
 0x121   :  { %v1186_v60 = vmul.f32 14.285714, %v202_v51  ;;  %v1192_v62 = vmul.f32 14.285714, %v234_v52  ;;  %v432_v43 = vpop.permute.xlu0 %431  ;;  %v1874_v44 = vmov 0  ;;  %v321_v47 = vadd.s32 72, %v1205_v8 }
 0x122   :  { %v1875_v44 = vsel %vm1306_vm15, 4294967295, %v1874_v44  ;;  %v601_v48 = vsel %vm1273_vm1, 1.0, %v1842_v28  ;;  %v602_v49 = vsel %vm1291_vm7, 1.0, %v1842_v28  ;;  %v1876_v50 = vmov 0  ;;  %vm1378_vm15 = vmand %vm463_vm14, %vm1357_vm8 }
 0x123   :  { %v1877_v50 = vsel %vm1321_vm3, 4294967295, %v1876_v50  ;;  %v1878_v51 = vmov 0  ;;  %v322_v52 = vadd.s32 80, %v1205_v8  ;;  %vm357_vm11 = vcmp.ne.s32.totalorder %v321_v47, %v1211_v13 }
 0x124   :  { %280 = vmax.xlane.f32.xlu1 %v1166_v53  ;;  %264 = vmax.xlane.f32.xlu0 %v1168_v54  ;;  %v1879_v51 = vsel %vm1327_vm4, 4294967295, %v1878_v51  ;;  %v1885_v6 = vsel %vm1357_vm8, 4294967295, %v1884_v6  ;;  %v1887_v9 = vsel %vm1363_vm0, 4294967295, %v1886_v9  ;;  %vm464_vm4 = vcmp.eq.s32.totalorder %v432_v43, %v1217_v16  ;;  %vm1372_vm6 = vmand %vm357_vm11, %vm370_vm2 }
 0x125   :  { %v438_v7 = vpop.permute.xlu0 %437  ;;  %vm358_vm3 = vcmp.ne.s32.totalorder %v322_v52, %v1211_v13  ;;  %v1889_v11 = vsel %vm1372_vm6, 4294967295, %v1888_v11  ;;  %v1891_v14 = vsel %vm1378_vm15, 4294967295, %v1890_v14  ;;  %v606_v18 = vsel %vm1363_vm0, 1.0, %v1842_v28  ;;  %vm1399_vm11 = vmand %vm464_vm4, %vm1372_vm6 }
 0x126   :  { %1892 = vst [vmem:[#allocation2_spill] sm:$0xff] %v1891_v14  ;;  %vm1393_vm14 = vmand %vm358_vm3, %vm370_vm2  ;;  %v1896_v20 = vsel %vm1399_vm11, 4294967295, %v1895_v20  ;;  %vm360_vm8 = vcmp.ne.s32.totalorder %v324_v10, %v1211_v13  ;;  %vm361_vm4 = vcmp.ne.s32.totalorder %v325_v15, %v1211_v13  ;;  %v607_v32 = vsel %vm1378_vm15, 1.0, %v1842_v28 }
 0x127   :  { %1897 = vst [vmem:[#allocation3_spill] sm:$0xff] %v1896_v20  ;;  %vm1407_vm0 = vmand %vm359_vm5, %vm370_vm2  ;;  %v1909_v43 = vmov 0  ;;  %v1915_v52 = vmov 0 }
 0x128   :  { %274 = vmax.xlane.f32.xlu0 %v1170_v55  ;;  %276 = vmax.xlane.f32.xlu1 %v1174_v56  ;;  %vm1426_vm5 = vmand %vm360_vm8, %vm370_vm2 }
 0x129   :  { %v444_v27 = vpop.permute.xlu0 %443  ;;  %v1904_v38 = vsel %vm1426_vm5, 4294967295, %v1903_v38 }
 0x12a   :  { %1905 = vst [vmem:[#allocation5_spill] sm:$0xff] %v1904_v38  ;;  %vm468_vm15 = vcmp.eq.s32.totalorder %v444_v27, %v1217_v16 }
 0x12c   :  { %290 = vmax.xlane.f32.xlu0 %v1176_v57  ;;  %292 = vmax.xlane.f32.xlu1 %v1178_v58 }
 0x130   :  { %270 = vmax.xlane.f32.xlu0 %v1184_v59  ;;  %272 = vmax.xlane.f32.xlu1 %v1186_v60 }
 0x134   :  { %286 = vmax.xlane.f32.xlu0 %v1190_v61  ;;  %288 = vmax.xlane.f32.xlu1 %v1192_v62 }
 0x145   :  { %446 = vperm.xlu1 %911, %v401_v0   ;;  %v1882_v0 = vmov 0 }
 0x146   :  { %v1883_v0 = vsel %vm1342_vm12, 4294967295, %v1882_v0  ;;  %vm466_vm12 = vcmp.eq.s32.totalorder %v438_v7, %v1217_v16 }
 0x147   :  { %vm1433_vm6 = vmand %vm466_vm12, %vm1407_vm0 }
 0x148   :  { %v1907_v41 = vsel %vm1433_vm6, 4294967295, %v1906_v41 }
 0x149   :  { %1908 = vst [vmem:[#allocation6_spill] sm:$0xff] %v1907_v41 }
 0x14a   :  { %449 = vperm.xlu0 %910, %v402_v3   ;;  %v435_v3 = vpop.permute.xlu1 %434 }
 0x14b   :  { %vm465_vm10 = vcmp.eq.s32.totalorder %v435_v3, %v1217_v16 }
 0x14c   :  { %vm1413_vm3 = vmand %vm465_vm10, %vm1393_vm14 }
 0x14d   :  { %v609_v47 = vsel %vm1413_vm3, 1.0, %v1842_v28 }
 0x14e   :  { %v441_v23 = vpop.permute.xlu1 %440 }
 0x14f   :  { %vm467_vm10 = vcmp.eq.s32.totalorder %v441_v23, %v1217_v16 }
 0x150   :  { %vm1452_vm12 = vmand %vm467_vm10, %vm1426_vm5 }
 0x151   :  { %v611_v2 = vsel %vm1452_vm12, 1.0, %v1842_v28 }
 0x169   :  { %615 = vadd.xlane.f32.xlu0 %v599_v29  ;;  %617 = vadd.xlane.f32.xlu1 %v600_v35  ;;  %v1900_v29 = vmov 0  ;;  %v608_v35 = vsel %vm1399_vm11, 1.0, %v1842_v28  ;;  %vm1440_vm11 = vmand %vm361_vm4, %vm370_vm2 }
 0x16a   :  { %v1901_v29 = vsel %vm1413_vm3, 4294967295, %v1900_v29  ;;  %v1910_v43 = vsel %vm1440_vm11, 4294967295, %v1909_v43  ;;  %vm1458_vm8 = vmand %vm468_vm15, %vm1440_vm11 }
 0x16b   :  { %1902 = vst [vmem:[#allocation4_spill] sm:$0xff] %v1901_v29  ;;  %1911 = vst [vmem:[#allocation7_spill] sm:$0xff] %v1910_v43  ;;  %v1916_v52 = vsel %vm1458_vm8, 4294967295, %v1915_v52  ;;  %v612_v3 = vsel %vm1458_vm8, 1.0, %v1842_v28 }
 0x16c   :  { %1917 = vst [vmem:[#allocation9_spill] sm:$0xff] %v1916_v52  ;;  %v326_v52 = vadd.s32 112, %v1205_v8 }
 0x16d   :  { %619 = vadd.xlane.f32.xlu0 %v601_v48  ;;  %621 = vadd.xlane.f32.xlu1 %v602_v49  ;;  %v610_v48 = vsel %vm1433_vm6, 1.0, %v1842_v28  ;;  %v1912_v49 = vmov 0 }
 0x16e   :  { %v1913_v49 = vsel %vm1452_vm12, 4294967295, %v1912_v49  ;;  %vm362_vm15 = vcmp.ne.s32.totalorder %v326_v52, %v1211_v13 }
 0x16f   :  { %1914 = vst [vmem:[#allocation8_spill] sm:$0xff] %v1913_v49  ;;  %vm1479_vm4 = vmand %vm362_vm15, %vm370_vm2 }
 0x171   :  { %623 = vadd.xlane.f32.xlu0 %v603_v4  ;;  %625 = vadd.xlane.f32.xlu1 %v604_v5 }
 0x175   :  { %627 = vadd.xlane.f32.xlu0 %v605_v17  ;;  %629 = vadd.xlane.f32.xlu1 %v606_v18 }
 0x179   :  { %631 = vadd.xlane.f32.xlu0 %v607_v32  ;;  %633 = vadd.xlane.f32.xlu1 %v608_v35 }
 0x17d   :  { %635 = vadd.xlane.f32.xlu0 %v609_v47  ;;  %637 = vadd.xlane.f32.xlu1 %v610_v48 }
 0x181   :  { %639 = vadd.xlane.f32.xlu0 %v611_v2  ;;  %641 = vadd.xlane.f32.xlu1 %v612_v3  ;;  %v327_v3 = vadd.s32 120, %v1205_v8  ;;  %v1922_v8 = vmov 0.0  }
 0x183   :  { %vm363_vm12 = vcmp.ne.s32.totalorder %v327_v3, %v1211_v13 }
 0x184   :  { %vm1503_vm6 = vmand %vm363_vm12, %vm370_vm2  ;;  %vm1927_vm2 = vnez %v1883_v0  ;;  %vm1932_vm12 = vnez %v1855_v19 }
 0x1a5   :  { %v283_v4 = vpop.xlane.xlu0 %282  ;;  %v267_v5 = vpop.xlane.xlu1 %266 }
 0x1a6   :  { %v296_v20 = vsub.f32 %v1148_v33, %v267_v5  ;;  %v1498_v38 = vsub.f32 %v1150_v34, %v283_v4  ;;  %v1943_v33 = vld [vmem:[#allocation2_spill] sm:$0xff] }
 0x1a8   :  { %v649_v12 = vsel %vm1273_vm1, %v296_v20, 0.0  ;;  %vm1930_vm1 = vnez %v1879_v51 }
 0x1a9   :  { %v263_v7 = vpop.xlane.xlu0 %262  ;;  %v269_v10 = vpop.xlane.xlu1 %268 }
 0x1aa   :  { %v294_v13 = vsub.f32 %v1152_v39, %v263_v7  ;;  %v297_v34 = vsub.f32 %v1154_v40, %v269_v10 }
 0x1ac   :  { %v487_v39 = vmul.f32 1.442695, %v294_v13  ;;  %v650_v10 = vsel %vm1291_vm7, %v297_v34, 0.0  ;;  %v647_v31 = vsel %vm1240_vm9, %v294_v13, 0.0  ;;  %vm1928_vm9 = vnez %v1887_v9 }
 0x1ad   :  { %v279_v15 = vpop.xlane.xlu0 %278  ;;  %v285_v17 = vpop.xlane.xlu1 %284  ;;  %vm1931_vm7 = vnez %v1861_v25 }
 0x1ae   :  { %v1522_v4 = vsub.f32 %v1160_v45, %v279_v15  ;;  %v1531_v3 = vsub.f32 %v1162_v46, %v285_v17 }
 0x1b0   :  { %v503_v45 = vmul.f32 1.442695, %v1522_v4  ;;  %v509_v15 = vmul.f32 1.442695, %v1531_v3 }
 0x1b1   :  { %v281_v18 = vpop.xlane.xlu1 %280  ;;  %v265_v23 = vpop.xlane.xlu0 %264 }
 0x1b2   :  { %v295_v7 = vsub.f32 %v1168_v54, %v265_v23  ;;  %v1542_v46 = vsub.f32 %v1166_v53, %v281_v18 }
 0x1b4   :  { %v648_v37 = vsel %vm1255_vm13, %v295_v7, 0.0  ;;  %v489_v17 = vmul.f32 1.442695, %v295_v7  ;;  %vm1929_vm13 = vnez %v1875_v44  ;;  %v505_v0 = vmul.f32 1.442695, %v1542_v46 }
 0x1b5   :  { %v275_v27 = vpop.xlane.xlu0 %274  ;;  %v277_v32 = vpop.xlane.xlu1 %276 }
 0x1b6   :  { %v300_v40 = vsub.f32 %v1170_v55, %v275_v27  ;;  %v301_v54 = vsub.f32 %v1174_v56, %v277_v32 }
 0x1b8   :  { %v653_v22 = vsel %vm1927_vm2, %v300_v40, 0.0  ;;  %v499_v23 = vmul.f32 1.442695, %v300_v40  ;;  %v501_v27 = vmul.f32 1.442695, %v301_v54  ;;  %vm1934_vm2 = vnez %v1885_v6 }
 0x1b9   :  { %v1468_v35 = vpop.xlane.xlu0 %290  ;;  %v1470_v47 = vpop.xlane.xlu1 %292 }
 0x1ba   :  { %v1552_v53 = vsub.f32 %v1176_v57, %v1468_v35  ;;  %v1560_v32 = vsub.f32 %v1178_v58, %v1470_v47 }
 0x1bc   :  { %v515_v57 = vmul.f32 1.442695, %v1552_v53 }
 0x1bd   :  { %v273_v48 = vpop.xlane.xlu1 %272  ;;  %v271_v28 = vpop.xlane.xlu0 %270 }
 0x1be   :  { %v298_v55 = vsub.f32 %v1184_v59, %v271_v28  ;;  %v299_v56 = vsub.f32 %v1186_v60, %v273_v48  ;;  %v654_v59 = vsel %vm1928_vm9, %v301_v54, 0.0  ;;  %vm1936_vm9 = vnez %v1889_v11 }
 0x1c0   :  { %v651_v26 = vsel %vm1929_vm13, %v298_v55, 0.0  ;;  %v652_v60 = vsel %vm1930_vm1, %v299_v56, 0.0  ;;  %v497_v13 = vmul.f32 1.442695, %v299_v56  ;;  %vm1937_vm13 = vnez %v1877_v50 }
 0x1c1   :  { %v1473_v2 = vpop.xlane.xlu1 %288  ;;  %v1483_v41 = vpop.xlane.xlu0 %286  ;;  %vm1939_vm1 = vnez %v1869_v36 }
 0x1c2   :  { %v306_v58 = vsub.f32 %v1190_v61, %v1483_v41 }
 0x1c5   :  { %v447_v29 = vpop.permute.xlu1 %446 }
 0x1c6   :  { %vm469_vm10 = vcmp.eq.s32.totalorder %v447_v29, %v1217_v16  ;;  %v491_v29 = vmul.f32 1.442695, %v296_v20  ;;  %v493_v20 = vmul.f32 1.442695, %v297_v34  ;;  %v511_v34 = vmul.f32 1.442695, %v306_v58 }
 0x1c7   :  { %vm1489_vm8 = vmand %vm469_vm10, %vm1479_vm4 }
 0x1c8   :  { %v613_v52 = vsel %vm1489_vm8, 1.0, %v1922_v8  ;;  %928 = vpow2.f32 %v491_v29 }
 0x1c9   :  { %v450_v43 = vpop.permute.xlu0 %449  ;;  %643 = vadd.xlane.f32.xlu0 %v613_v52  ;;  %v495_v52 = vmul.f32 1.442695, %v298_v55 }
 0x1ca   :  { %vm470_vm15 = vcmp.eq.s32.totalorder %v450_v43, %v1217_v16  ;;  %v507_v43 = vmul.f32 1.442695, %v1498_v38 }
 0x1cb   :  { %vm1510_vm10 = vmand %vm470_vm15, %vm1503_vm6  ;;  %vm1933_vm15 = vnez %v1865_v30 }
 0x1cc   :  { %v614_v16 = vsel %vm1510_vm10, 1.0, %v1922_v8  ;;  %930 = vpow2.f32 %v507_v43  ;;  %v517_v8 = vmul.f32 1.442695, %v1560_v32 }
 0x1cd   :  { %645 = vadd.xlane.f32.xlu1 %v614_v16  ;;  %667 = vadd.xlane.f32.xlu0 %v649_v12  ;;  %932 = vpow2.f32 %v487_v39  ;;  %v307_v16 = vsub.f32 %v1192_v62, %v1473_v2 }
 0x1ce   :  { %934 = vpow2.f32 %v493_v20 }
 0x1cf   :  { %936 = vpow2.f32 %v503_v45  ;;  %v513_v6 = vmul.f32 1.442695, %v307_v16 }
 0x1d0   :  { %938 = vpow2.f32 %v509_v15  ;;  %v657_v15 = vsel %vm1413_vm3, %v1498_v38, 0.0  ;;  %v662_v38 = vsel %vm1510_vm10, %v1560_v32, 0.0  ;;  %vm807_vm3 = vcmask 7168  }
 0x1d1   :  { %669 = vadd.xlane.f32.xlu1 %v650_v10  ;;  %663 = vadd.xlane.f32.xlu0 %v647_v31  ;;  %940 = vpow2.f32 %v489_v17  ;;  %v1948_v17 = vld [vmem:[#allocation6_spill] sm:$0xff] }
 0x1d2   :  { %v929_v28 = vpop.eup %928  ;;  %942 = vpow2.f32 %v505_v0 }
 0x1d3   :  { %v521_v44 = vsel %vm1931_vm7, %v929_v28, 0.0  ;;  %944 = vpow2.f32 %v499_v23  ;;  %vm1940_vm7 = vnez %v1873_v42 }
 0x1d4   :  { %946 = vpow2.f32 %v501_v27 }
 0x1d5   :  { %665 = vadd.xlane.f32.xlu1 %v648_v37  ;;  %675 = vadd.xlane.f32.xlu0 %v653_v22  ;;  %948 = vpow2.f32 %v515_v57  ;;  %v1945_v37 = vld [vmem:[#allocation3_spill] sm:$0xff] }
 0x1d6   :  { %v931_v18 = vpop.eup %930  ;;  %950 = vpow2.f32 %v517_v8 }
 0x1d7   :  { %v933_v9 = vpop.eup %932  ;;  %v529_v25 = vsel %vm1393_vm14, %v931_v18, 0.0  ;;  %952 = vpow2.f32 %v495_v52  ;;  %vm1935_vm14 = vnez %v1857_v21 }
 0x1d8   :  { %v935_v35 = vpop.eup %934  ;;  %v519_v51 = vsel %vm1932_vm12, %v933_v9, 0.0  ;;  %954 = vpow2.f32 %v497_v13 }
 0x1d9   :  { %677 = vadd.xlane.f32.xlu1 %v654_v59  ;;  %671 = vadd.xlane.f32.xlu0 %v651_v26  ;;  %v937_v48 = vpop.eup %936  ;;  %v522_v29 = vsel %vm1933_vm15, %v935_v35, 0.0  ;;  %956 = vpow2.f32 %v511_v34  ;;  %v1950_v59 = vld [vmem:[#allocation8_spill] sm:$0xff] }
 0x1da   :  { %v939_v47 = vpop.eup %938  ;;  %v527_v19 = vsel %vm1934_vm2, %v937_v48, 0.0  ;;  %958 = vpow2.f32 %v513_v6 }
 0x1db   :  { %v941_v1 = vpop.eup %940  ;;  %v530_v61 = vsel %vm1407_vm0, %v939_v47, 0.0  ;;  %vm1938_vm0 = vnez %v1881_v63 }
 0x1dc   :  { %v943_v12 = vpop.eup %942  ;;  %v520_v30 = vsel %vm1935_vm14, %v941_v1, 0.0 }
 0x1dd   :  { %673 = vadd.xlane.f32.xlu1 %v652_v60  ;;  %539 = vadd.xlane.f32.xlu0 %v521_v44  ;;  %v945_v41 = vpop.eup %944  ;;  %v528_v39 = vsel %vm1936_vm9, %v943_v12, 0.0 }
 0x1de   :  { %v947_v43 = vpop.eup %946  ;;  %v525_v62 = vsel %vm1937_vm13, %v945_v41, 0.0 }
 0x1df   :  { %v949_v2 = vpop.eup %948  ;;  %v526_v21 = vsel %vm1938_vm0, %v947_v43, 0.0 }
 0x1e0   :  { %v951_v24 = vpop.eup %950  ;;  %v533_v7 = vsel %vm1479_vm4, %v949_v2, 0.0  ;;  %vm1946_vm4 = vnez %v1945_v37 }
 0x1e1   :  { %535 = vadd.xlane.f32.xlu1 %v519_v51  ;;  %555 = vadd.xlane.f32.xlu0 %v529_v25  ;;  %v953_v40 = vpop.eup %952  ;;  %v534_v11 = vsel %vm1503_vm6, %v951_v24, 0.0  ;;  %vm1944_vm6 = vnez %v1943_v33  ;;  %v656_v42 = vsel %vm1946_vm4, %v1542_v46, 0.0  ;;  %v661_v46 = vsel %vm1489_vm8, %v1552_v53, 0.0 }
 0x1e2   :  { %v955_v10 = vpop.eup %954  ;;  %v523_v50 = vsel %vm1939_vm1, %v953_v40, 0.0  ;;  %v655_v36 = vsel %vm1944_vm6, %v1522_v4, 0.0  ;;  %v1952_v4 = vld [vmem:[#allocation9_spill] sm:$0xff] }
 0x1e3   :  { %v957_v31 = vpop.eup %956  ;;  %v524_v63 = vsel %vm1940_vm7, %v955_v10, 0.0  ;;  %vm1953_vm12 = vnez %v1952_v4 }
 0x1e4   :  { %v531_v49 = vsel %vm1426_vm5, %v957_v31, 0.0  ;;  %v959_v45 = vpop.eup %958  ;;  %vm1949_vm5 = vnez %v1948_v17  ;;  %v660_v28 = vsel %vm1953_vm12, %v307_v16, 0.0 }
 0x1e5   :  { %541 = vadd.xlane.f32.xlu1 %v522_v29  ;;  %551 = vadd.xlane.f32.xlu0 %v527_v19  ;;  %v532_v55 = vsel %vm1440_vm11, %v959_v45, 0.0  ;;  %v658_v56 = vsel %vm1949_vm5, %v1531_v3, 0.0  ;;  %vm1951_vm11 = vnez %v1950_v59  ;;  %v777_v45 = vld [vmem:[%s1823_s4 + $0x10] sm:$0xff] }
 0x1e6   :  { %v659_v26 = vsel %vm1951_vm11, %v306_v58, 0.0 }
 0x1e9   :  { %557 = vadd.xlane.f32.xlu1 %v530_v61  ;;  %537 = vadd.xlane.f32.xlu0 %v520_v30 }
 0x1ed   :  { %553 = vadd.xlane.f32.xlu1 %v528_v39  ;;  %547 = vadd.xlane.f32.xlu0 %v525_v62 }
 0x1f1   :  { %549 = vadd.xlane.f32.xlu1 %v526_v21  ;;  %563 = vadd.xlane.f32.xlu0 %v533_v7 }
 0x1f5   :  { %565 = vadd.xlane.f32.xlu1 %v534_v11  ;;  %543 = vadd.xlane.f32.xlu0 %v523_v50 }
 0x1f6   :  { %v1620_v3 = vpop.xlane.xlu0 %615  ;;  %v1622_v0 = vpop.xlane.xlu1 %617 }
 0x1f7   :  { %v727_v16 = vmax.f32 %v1620_v3, 1.0  ;;  %v728_v30 = vmax.f32 %v1622_v0, 1.0 }
 0x1f9   :  { %545 = vadd.xlane.f32.xlu1 %v524_v63  ;;  %559 = vadd.xlane.f32.xlu0 %v531_v49 }
 0x1fa   :  { %v620_v23 = vpop.xlane.xlu0 %619  ;;  %v1624_v18 = vpop.xlane.xlu1 %621 }
 0x1fb   :  { %v729_v34 = vmax.f32 %v620_v23, 1.0  ;;  %v730_v41 = vmax.f32 %v1624_v18, 1.0 }
 0x1fd   :  { %561 = vadd.xlane.f32.xlu1 %v532_v55  ;;  %679 = vadd.xlane.f32.xlu0 %v655_v36 }
 0x1fe   :  { %v1626_v60 = vpop.xlane.xlu0 %623  ;;  %v1628_v44 = vpop.xlane.xlu1 %625 }
 0x1ff   :  { %v731_v6 = vmax.f32 %v1626_v60, 1.0  ;;  %v732_v2 = vmax.f32 %v1628_v44, 1.0 }
 0x201   :  { %681 = vadd.xlane.f32.xlu1 %v656_v42  ;;  %683 = vadd.xlane.f32.xlu0 %v657_v15 }
 0x202   :  { %v1630_v14 = vpop.xlane.xlu0 %627  ;;  %v1632_v53 = vpop.xlane.xlu1 %629 }
 0x203   :  { %v733_v24 = vmax.f32 %v1630_v14, 1.0  ;;  %v734_v50 = vmax.f32 %v1632_v53, 1.0 }
 0x205   :  { %685 = vadd.xlane.f32.xlu1 %v658_v56  ;;  %687 = vadd.xlane.f32.xlu0 %v659_v26 }
 0x206   :  { %v1634_v9 = vpop.xlane.xlu0 %631  ;;  %v1636_v5 = vpop.xlane.xlu1 %633 }
 0x207   :  { %v735_v37 = vmax.f32 %v1634_v9, 1.0  ;;  %v736_v15 = vmax.f32 %v1636_v5, 1.0 }
 0x209   :  { %689 = vadd.xlane.f32.xlu1 %v660_v28  ;;  %691 = vadd.xlane.f32.xlu0 %v661_v46 }
 0x20a   :  { %v1638_v27 = vpop.xlane.xlu0 %635  ;;  %v1640_v32 = vpop.xlane.xlu1 %637 }
 0x20d   :  { %693 = vadd.xlane.f32.xlu1 %v662_v38  ;;  %v775_v38 = vld [vmem:[%s1823_s4] sm:$0xff] }
 0x20e   :  { %v1642_v57 = vpop.xlane.xlu0 %639  ;;  %v1644_v35 = vpop.xlane.xlu1 %641 }
 0x256   :  { %v1646_v51 = vpop.xlane.xlu0 %643 }
 0x25a   :  { %v668_v25 = vpop.xlane.xlu0 %667  ;;  %v1648_v48 = vpop.xlane.xlu1 %645 }
 0x25e   :  { %v1650_v8 = vpop.xlane.xlu0 %663  ;;  %v1652_v52 = vpop.xlane.xlu1 %669 }
 0x262   :  { %v1654_v58 = vpop.xlane.xlu0 %675  ;;  %v1656_v47 = vpop.xlane.xlu1 %665 }
 0x266   :  { %v1658_v29 = vpop.xlane.xlu0 %671  ;;  %v1660_v19 = vpop.xlane.xlu1 %677 }
 0x26a   :  { %v540_v1 = vpop.xlane.xlu0 %539  ;;  %v1662_v13 = vpop.xlane.xlu1 %673 }
 0x26b   :  { %960 = vlog2.f32 %v540_v1 }
 0x26e   :  { %v556_v12 = vpop.xlane.xlu0 %555  ;;  %v536_v61 = vpop.xlane.xlu1 %535 }
 0x26f   :  { %962 = vlog2.f32 %v536_v61 }
 0x270   :  { %964 = vrcp.f32 %v729_v34 }
 0x271   :  { %966 = vrcp.f32 %v727_v16 }
 0x272   :  { %v552_v43 = vpop.xlane.xlu0 %551  ;;  %v542_v39 = vpop.xlane.xlu1 %541  ;;  %968 = vrcp.f32 %v728_v30 }
 0x273   :  { %970 = vlog2.f32 %v542_v39 }
 0x274   :  { %972 = vrcp.f32 %v730_v41 }
 0x275   :  { %v961_v62 = vpop.eup %960  ;;  %974 = vrcp.f32 %v731_v6 }
 0x276   :  { %v572_v21 = vmul.f32 0.6931472, %v961_v62  ;;  %v538_v7 = vpop.xlane.xlu0 %537  ;;  %v558_v40 = vpop.xlane.xlu1 %557  ;;  %v738_v62 = vmax.f32 %v1640_v32, 1.0 }
 0x277   :  { %976 = vlog2.f32 %v538_v7 }
 0x278   :  { %v697_v10 = vmul.f32 %v620_v23, %v572_v21  ;;  %978 = vlog2.f32 %v552_v43  ;;  %v737_v23 = vmax.f32 %v1638_v27, 1.0  ;;  %v778_v43 = vld [vmem:[%s1823_s4 + $0x18] sm:$0xff]  ;;  %v739_v21 = vmax.f32 %v1642_v57, 1.0 }
 0x279   :  { %980 = vrcp.f32 %v732_v2  ;;  %v963_v11 = vpop.eup %962 }
 0x27a   :  { %982 = vrcp.f32 %v733_v24  ;;  %v713_v31 = vsub.f32 %v668_v25, %v697_v10  ;;  %v548_v63 = vpop.xlane.xlu0 %547  ;;  %v554_v20 = vpop.xlane.xlu1 %553  ;;  %v568_v54 = vmul.f32 0.6931472, %v963_v11 }
 0x27b   :  { %v965_v49 = vpop.eup %964  ;;  %984 = vlog2.f32 %v548_v63 }
 0x27c   :  { %v967_v55 = vpop.eup %966  ;;  %v748_v33 = vmul.f32 %v965_v49, %v713_v31  ;;  %986 = vlog2.f32 %v556_v12  ;;  %v695_v42 = vmul.f32 %v1620_v3, %v568_v54  ;;  %v776_v31 = vld [vmem:[%s1823_s4 + $0x8] sm:$0xff] }
 0x27d   :  { %v969_v36 = vpop.eup %968  ;;  %988 = vlog2.f32 %v554_v20  ;;  %v741_v20 = vmax.f32 %v1646_v51, 1.0 }
 0x27e   :  { %v971_v22 = vpop.eup %970  ;;  %990 = vrcp.f32 %v734_v50  ;;  %v793_v17 = vmul.f32 %v777_v45, %v748_v33  ;;  %v564_v56 = vpop.xlane.xlu0 %563  ;;  %v711_v4 = vsub.f32 %v1650_v8, %v695_v42 }
 0x27f   :  { %v550_v59 = vpop.xlane.xlu1 %549  ;;  %v973_v26 = vpop.eup %972  ;;  %v574_v28 = vmul.f32 0.6931472, %v971_v22  ;;  %992 = vlog2.f32 %v558_v40 }
 0x280   :  { %v1678_v46 = vpop.eup %974  ;;  %810 = vst.msk [vmem:[%s1824_s5 + $0x10] sm:$0xff] %vm807_vm3, %v793_v17  ;;  %994 = vlog2.f32 %v550_v59  ;;  %v744_v25 = vmul.f32 %v967_v55, %v711_v4  ;;  %v781_v17 = vld [vmem:[%s1823_s4 + $0x30] sm:$0xff]  ;;  %v740_v4 = vmax.f32 %v1644_v35, 1.0 }
 0x281   :  { %v977_v3 = vpop.eup %976  ;;  %996 = vrcp.f32 %v735_v37  ;;  %v698_v8 = vmul.f32 %v1624_v18, %v574_v28 }
 0x282   :  { %v979_v1 = vpop.eup %978  ;;  %998 = vrcp.f32 %v736_v15  ;;  %v570_v34 = vmul.f32 0.6931472, %v977_v3  ;;  %v544_v16 = vpop.xlane.xlu0 %543  ;;  %v791_v30 = vmul.f32 %v775_v38, %v744_v25 }
 0x283   :  { %v566_v12 = vpop.xlane.xlu1 %565  ;;  %v1689_v61 = vpop.eup %980  ;;  %v714_v41 = vsub.f32 %v1652_v52, %v698_v8  ;;  %1000 = vlog2.f32 %v544_v16  ;;  %v584_v2 = vmul.f32 0.6931472, %v979_v1  ;;  %v742_v1 = vmax.f32 %v1648_v48, 1.0 }
 0x284   :  { %v983_v6 = vpop.eup %982  ;;  %v696_v39 = vmul.f32 %v1622_v0, %v570_v34  ;;  %1002 = vlog2.f32 %v564_v56  ;;  %808 = vst.msk [vmem:[%s1824_s5] sm:$0xff] %vm807_vm3, %v791_v30 }
 0x285   :  { %v985_v18 = vpop.eup %984  ;;  %1004 = vrcp.f32 %v737_v23  ;;  %v750_v52 = vmul.f32 %v973_v26, %v714_v41  ;;  %v703_v55 = vmul.f32 %v1634_v9, %v584_v2 }
 0x286   :  { %v987_v24 = vpop.eup %986  ;;  %v712_v7 = vsub.f32 %v1656_v47, %v696_v39  ;;  %v580_v40 = vmul.f32 0.6931472, %v985_v18  ;;  %1006 = vlog2.f32 %v566_v12  ;;  %v560_v0 = vpop.xlane.xlu0 %559 }
 0x287   :  { %v546_v10 = vpop.xlane.xlu1 %545  ;;  %v989_v11 = vpop.eup %988  ;;  %v794_v50 = vmul.f32 %v778_v43, %v750_v52  ;;  %1008 = vlog2.f32 %v560_v0  ;;  %v588_v47 = vmul.f32 0.6931472, %v987_v24 }
 0x288   :  { %v991_v63 = vpop.eup %990  ;;  %v746_v49 = vmul.f32 %v969_v36, %v712_v7  ;;  %v701_v45 = vmul.f32 %v1630_v14, %v580_v40  ;;  %1010 = vlog2.f32 %v546_v10  ;;  %v586_v22 = vmul.f32 0.6931472, %v989_v11  ;;  %v784_v7 = vld [vmem:[%s1823_s4 + $0x48] sm:$0xff] }
 0x289   :  { %v993_v54 = vpop.eup %992  ;;  %1012 = vrcp.f32 %v738_v62  ;;  %811 = vst.msk [vmem:[%s1824_s5 + $0x18] sm:$0xff] %vm807_vm3, %v794_v50  ;;  %v705_v25 = vmul.f32 %v1638_v27, %v588_v47 }
 0x28a   :  { %v995_v33 = vpop.eup %994  ;;  %1014 = vrcp.f32 %v739_v21  ;;  %v792_v37 = vmul.f32 %v776_v31, %v746_v49  ;;  %v717_v42 = vsub.f32 %v1654_v58, %v701_v45  ;;  %v680_v36 = vpop.xlane.xlu0 %679  ;;  %v783_v58 = vld [vmem:[%s1823_s4 + $0x40] sm:$0xff]  ;;  %v590_v38 = vmul.f32 0.6931472, %v993_v54 }
 0x28b   :  { %v562_v15 = vpop.xlane.xlu1 %561  ;;  %v997_v14 = vpop.eup %996  ;;  %v582_v56 = vmul.f32 0.6931472, %v995_v33  ;;  %v719_v59 = vsub.f32 %v680_v36, %v703_v55  ;;  %v704_v30 = vmul.f32 %v1636_v5, %v586_v22  ;;  %v785_v5 = vld [vmem:[%s1823_s4 + $0x50] sm:$0xff]  ;;  %v779_v49 = vld [vmem:[%s1823_s4 + $0x20] sm:$0xff] }
 0x28c   :  { %1016 = vlog2.f32 %v562_v15  ;;  %v999_v26 = vpop.eup %998  ;;  %809 = vst.msk [vmem:[%s1824_s5 + $0x8] sm:$0xff] %vm807_vm3, %v792_v37  ;;  %v756_v9 = vmul.f32 %v983_v6, %v717_v42 }
 0x28d   :  { %1018 = vrcp.f32 %v741_v20  ;;  %v1001_v28 = vpop.eup %1000  ;;  %v702_v3 = vmul.f32 %v1632_v53, %v582_v56  ;;  %v760_v23 = vmul.f32 %v997_v14, %v719_v59  ;;  %v782_v53 = vld [vmem:[%s1823_s4 + $0x38] sm:$0xff] }
 0x28e   :  { %v1003_v8 = vpop.eup %1002  ;;  %v797_v34 = vmul.f32 %v781_v17, %v756_v9  ;;  %v576_v16 = vmul.f32 0.6931472, %v1001_v28  ;;  %v684_v12 = vpop.xlane.xlu0 %683  ;;  %1020 = vrcp.f32 %v740_v4  ;;  %v787_v4 = vld [vmem:[%s1823_s4 + $0x60] sm:$0xff] }
 0x28f   :  { %v682_v41 = vpop.xlane.xlu1 %681  ;;  %v1005_v6 = vpop.eup %1004  ;;  %v718_v43 = vsub.f32 %v1660_v19, %v702_v3  ;;  %v799_v39 = vmul.f32 %v783_v58, %v760_v23  ;;  %v721_v18 = vsub.f32 %v684_v12, %v705_v25  ;;  %v596_v52 = vmul.f32 0.6931472, %v1003_v8 }
 0x290   :  { %v1007_v62 = vpop.eup %1006  ;;  %814 = vst.msk [vmem:[%s1824_s5 + $0x30] sm:$0xff] %vm807_vm3, %v797_v34  ;;  %v699_v27 = vmul.f32 %v1626_v60, %v576_v16  ;;  %v720_v19 = vsub.f32 %v682_v41, %v704_v30  ;;  %v706_v60 = vmul.f32 %v1640_v32, %v590_v38  ;;  %1022 = vrcp.f32 %v742_v1 }
 0x291   :  { %v1009_v2 = vpop.eup %1008  ;;  %v758_v24 = vmul.f32 %v991_v63, %v718_v43  ;;  %816 = vst.msk [vmem:[%s1824_s5 + $0x40] sm:$0xff] %vm807_vm3, %v799_v39  ;;  %v764_v21 = vmul.f32 %v1005_v6, %v721_v18  ;;  %v598_v22 = vmul.f32 0.6931472, %v1007_v62 }
 0x292   :  { %v1011_v40 = vpop.eup %1010  ;;  %v715_v0 = vsub.f32 %v1658_v29, %v699_v27  ;;  %v592_v10 = vmul.f32 0.6931472, %v1009_v2  ;;  %v762_v11 = vmul.f32 %v999_v26, %v720_v19  ;;  %v688_v50 = vpop.xlane.xlu0 %687  ;;  %v786_v29 = vld [vmem:[%s1823_s4 + $0x58] sm:$0xff] }
 0x293   :  { %v686_v31 = vpop.xlane.xlu1 %685  ;;  %v1013_v63 = vpop.eup %1012  ;;  %v798_v20 = vmul.f32 %v782_v53, %v758_v24  ;;  %v578_v45 = vmul.f32 0.6931472, %v1011_v40  ;;  %v801_v54 = vmul.f32 %v785_v5, %v764_v21  ;;  %v710_v25 = vmul.f32 %v1648_v48, %v598_v22  ;;  %v790_v48 = vld [vmem:[%s1823_s4 + $0x78] sm:$0xff] }
 0x294   :  { %v722_v47 = vsub.f32 %v686_v31, %v706_v60  ;;  %v1015_v55 = vpop.eup %1014  ;;  %v752_v32 = vmul.f32 %v1678_v46, %v715_v0  ;;  %v800_v33 = vmul.f32 %v784_v7, %v762_v11  ;;  %v707_v37 = vmul.f32 %v1642_v57, %v592_v10 }
 0x295   :  { %815 = vst.msk [vmem:[%s1824_s5 + $0x38] sm:$0xff] %vm807_vm3, %v798_v20  ;;  %v700_v36 = vmul.f32 %v1628_v44, %v578_v45  ;;  %818 = vst.msk [vmem:[%s1824_s5 + $0x50] sm:$0xff] %vm807_vm3, %v801_v54  ;;  %v709_v57 = vmul.f32 %v1646_v51, %v596_v52  ;;  %v780_v51 = vld [vmem:[%s1823_s4 + $0x28] sm:$0xff] }
 0x296   :  { %v1017_v42 = vpop.eup %1016  ;;  %v766_v46 = vmul.f32 %v1013_v63, %v722_v47  ;;  %v795_v14 = vmul.f32 %v779_v49, %v752_v32  ;;  %817 = vst.msk [vmem:[%s1824_s5 + $0x48] sm:$0xff] %vm807_vm3, %v800_v33  ;;  %v723_v56 = vsub.f32 %v688_v50, %v707_v37  ;;  %v692_v59 = vpop.xlane.xlu0 %691 }
 0x297   :  { %v1019_v15 = vpop.eup %1018  ;;  %v594_v17 = vmul.f32 0.6931472, %v1017_v42  ;;  %v690_v26 = vpop.xlane.xlu1 %689  ;;  %v716_v44 = vsub.f32 %v1662_v13, %v700_v36  ;;  %v725_v58 = vsub.f32 %v692_v59, %v709_v57  ;;  %v789_v13 = vld [vmem:[%s1823_s4 + $0x70] sm:$0xff] }
 0x298   :  { %v802_v9 = vmul.f32 %v786_v29, %v766_v46  ;;  %812 = vst.msk [vmem:[%s1824_s5 + $0x20] sm:$0xff] %vm807_vm3, %v795_v14  ;;  %v768_v28 = vmul.f32 %v1015_v55, %v723_v56  ;;  %v1021_v8 = vpop.eup %1020 }
 0x299   :  { %v708_v38 = vmul.f32 %v1644_v35, %v594_v17  ;;  %v754_v3 = vmul.f32 %v1689_v61, %v716_v44  ;;  %v772_v23 = vmul.f32 %v1019_v15, %v725_v58  ;;  %v788_v35 = vld [vmem:[%s1823_s4 + $0x68] sm:$0xff] }
 0x29a   :  { %819 = vst.msk [vmem:[%s1824_s5 + $0x58] sm:$0xff] %vm807_vm3, %v802_v9  ;;  %v803_v1 = vmul.f32 %v787_v4, %v768_v28  ;;  %v1023_v61 = vpop.eup %1022 }
 0x29b   :  { %v724_v34 = vsub.f32 %v690_v26, %v708_v38  ;;  %v694_v16 = vpop.xlane.xlu1 %693  ;;  %v796_v12 = vmul.f32 %v780_v51, %v754_v3  ;;  %v805_v30 = vmul.f32 %v789_v13, %v772_v23 }
 0x29c   :  { %v726_v41 = vsub.f32 %v694_v16, %v710_v25  ;;  %820 = vst.msk [vmem:[%s1824_s5 + $0x60] sm:$0xff] %vm807_vm3, %v803_v1 }
 0x29d   :  { %v770_v6 = vmul.f32 %v1021_v8, %v724_v34  ;;  %813 = vst.msk [vmem:[%s1824_s5 + $0x28] sm:$0xff] %vm807_vm3, %v796_v12  ;;  %822 = vst.msk [vmem:[%s1824_s5 + $0x70] sm:$0xff] %vm807_vm3, %v805_v30 }
 0x29e   :  { %v774_v43 = vmul.f32 %v1023_v61, %v726_v41 }
 0x29f   :  { %v804_v39 = vmul.f32 %v788_v35, %v770_v6 }
 0x2a0   :  { %v806_v18 = vmul.f32 %v790_v48, %v774_v43 }
 0x2a1   :  { %821 = vst.msk [vmem:[%s1824_s5 + $0x68] sm:$0xff] %vm807_vm3, %v804_v39 }
 0x2a2   :  { %823 = vst.msk [vmem:[%s1824_s5 + $0x78] sm:$0xff] %vm807_vm3, %v806_v18 }

// kernel: tpu_custom_call.1
= control target key start
LH: loop header
LB: loop body
LE: loop exit
PB: predicated region body
PF: predicated region fallthrough
CT: control target
= control target key end

     0   :  { %v1024_v1 = vmov 0   ;;  %s1819_s1 = inlined_call_operand.vmem [shape: bf16[128,128], index: 1, kind: input, shape index: {}]   ;;  %s1820_s0 = inlined_call_operand.vmem [shape: bf16[128,128], index: 0, kind: input, shape index: {}]   ;;  %s1821_s2 = inlined_call_operand.vmem [shape: s32[128,1], index: 2, kind: input, shape index: {}]   ;;  %s1822_s3 = inlined_call_operand.vmem [shape: s32[1,128], index: 3, kind: input, shape index: {}]   ;;  %s1823_s4 = inlined_call_operand.vmem [shape: f32[128,1], index: 4, kind: input, shape index: {}]   ;;  %s1824_s5 = inlined_call_operand.vmem [shape: f32[128,1], index: 5, kind: output, shape index: {}]  }
   0x1   :  { %v912_v0 = vld [vmem:[%s1819_s1] sm:$0xff]   ;;  %911 = vset.pattern.permute.xlu1 %v1024_v1  ;;  %910 = vset.pattern.permute.xlu0 %v1024_v1  ;;  %v913_v2 = vld [vmem:[%s1819_s1 + $0x8] sm:$0xff]   ;;  %v914_v3 = vld [vmem:[%s1819_s1 + $0x10] sm:$0xff]  }
   0x2   :  { %860 = vmatprep.subr.bf16.mxu0 %v912_v0  ;;  %892 = vmatprep.subr.bf16.mxu1 %v912_v0  ;;  %v920_v4 = vld [vmem:[%s1820_s0] sm:$0xff]   ;;  %v915_v6 = vld [vmem:[%s1819_s1 + $0x18] sm:$0xff]   ;;  %v388_v7 = vld [vmem:[%s1821_s2 + $0x8] sm:$0xff] }
   0x3   :  { %861 = vmatpush3.bf16.xpose.msra.mxu0 %v912_v0  ;;  %900 = vmatpush3.bf16.xpose.msra.mxu1 %v912_v0  ;;  %v921_v5 = vld [vmem:[%s1820_s0 + $0x20] sm:$0xff]   ;;  %v389_v8 = vld [vmem:[%s1821_s2 + $0x10] sm:$0xff]  ;;  %v390_v10 = vld [vmem:[%s1821_s2 + $0x18] sm:$0xff] }
   0x4   :  { %862 = vmatprep.subr.bf16.mxu0 %v913_v2  ;;  %893 = vmatprep.subr.bf16.mxu1 %v913_v2  ;;  %v387_v9 = vld [vmem:[%s1821_s2] sm:$0xff]  ;;  %v396_v11 = vld [vmem:[%s1821_s2 + $0x48] sm:$0xff]  ;;  %v398_v14 = vld [vmem:[%s1821_s2 + $0x58] sm:$0xff] }
   0x5   :  { %876 = vmatprep.mubr.bf16.mxu0 %v920_v4  ;;  %884 = vmatprep.mubr.bf16.mxu1 %v921_v5  ;;  %v916_v12 = vld [vmem:[%s1819_s1 + $0x20] sm:$0xff]   ;;  %v392_v15 = vld [vmem:[%s1821_s2 + $0x28] sm:$0xff]  ;;  %v393_v18 = vld [vmem:[%s1821_s2 + $0x30] sm:$0xff]  ;;  %v311_v5 = vlaneseq }
   0x6   :  { %407 = vperm.xlu1 %911, %v388_v7   ;;  %404 = vperm.xlu0 %910, %v387_v9   ;;  %v391_v13 = vld [vmem:[%s1821_s2 + $0x20] sm:$0xff]  ;;  %v400_v16 = vld [vmem:[%s1821_s2 + $0x68] sm:$0xff]  ;;  %v394_v19 = vld [vmem:[%s1821_s2 + $0x38] sm:$0xff] }
   0x7   :  { %v917_v17 = vld [vmem:[%s1819_s1 + $0x28] sm:$0xff]   ;;  %v918_v20 = vld [vmem:[%s1819_s1 + $0x30] sm:$0xff]   ;;  %v395_v21 = vld [vmem:[%s1821_s2 + $0x40] sm:$0xff] }
   0x8   :  { %v397_v22 = vld [vmem:[%s1821_s2 + $0x50] sm:$0xff]  ;;  %v919_v23 = vld [vmem:[%s1819_s1 + $0x38] sm:$0xff]   ;;  %v399_v24 = vld [vmem:[%s1821_s2 + $0x60] sm:$0xff] }
   0x9   :  { %v922_v25 = vld [vmem:[%s1820_s0 + $0x8] sm:$0xff]   ;;  %v924_v27 = vld [vmem:[%s1820_s0 + $0x10] sm:$0xff]   ;;  %v925_v29 = vld [vmem:[%s1820_s0 + $0x18] sm:$0xff]  }
   0xa   :  { %410 = vperm.xlu1 %911, %v389_v8   ;;  %431 = vperm.xlu0 %910, %v396_v11   ;;  %v923_v26 = vld [vmem:[%s1820_s0 + $0x28] sm:$0xff]   ;;  %v926_v28 = vld [vmem:[%s1820_s0 + $0x30] sm:$0xff]   ;;  %v927_v30 = vld [vmem:[%s1820_s0 + $0x38] sm:$0xff]   ;;  %v1205_v8 = vshrl.u32 %v311_v5, 7 }
   0xb   :  { %863 = vmatpush3.bf16.xpose.msra.mxu0 %v913_v2  ;;  %901 = vmatpush3.bf16.xpose.msra.mxu1 %v913_v2  ;;  %v401_v0 = vld [vmem:[%s1821_s2 + $0x70] sm:$0xff] }
   0xc   :  { %864 = vmatprep.subr.bf16.mxu0 %v914_v3  ;;  %894 = vmatprep.subr.bf16.mxu1 %v914_v3  ;;  %v368_v9 = vsub.s32 0, %v1205_v8 }
   0xe   :  { %413 = vperm.xlu1 %911, %v390_v10   ;;  %437 = vperm.xlu0 %910, %v398_v14   ;;  %v313_v14 = vadd.s32 8, %v1205_v8 }
  0x12   :  { %416 = vperm.xlu1 %911, %v391_v13   ;;  %443 = vperm.xlu0 %910, %v400_v16   ;;  %v1211_v13 = vand.u32 127, %v311_v5 }
  0x13   :  { %865 = vmatpush3.bf16.xpose.msra.mxu0 %v914_v3  ;;  %902 = vmatpush3.bf16.xpose.msra.mxu1 %v914_v3  ;;  %v402_v3 = vld [vmem:[%s1821_s2 + $0x78] sm:$0xff] }
  0x14   :  { %866 = vmatprep.subr.bf16.mxu0 %v915_v6  ;;  %895 = vmatprep.subr.bf16.mxu1 %v915_v6  ;;  %vm348_vm1 = vcmp.ne.s32.totalorder %v1205_v8, %v1211_v13  ;;  %vm349_vm3 = vcmp.ne.s32.totalorder %v313_v14, %v1211_v13  ;;  %v1890_v14 = vmov 0 }
  0x16   :  { %419 = vperm.xlu1 %911, %v392_v15   ;;  %v314_v15 = vadd.s32 16, %v1205_v8 }
  0x18   :  { %vm350_vm6 = vcmp.ne.s32.totalorder %v314_v15, %v1211_v13  ;;  %v325_v15 = vadd.s32 104, %v1205_v8 }
  0x1a   :  { %422 = vperm.xlu1 %911, %v393_v18  }
  0x1b   :  { %867 = vmatpush3.bf16.xpose.msra.mxu0 %v915_v6  ;;  %903 = vmatpush3.bf16.xpose.msra.mxu1 %v915_v6  ;;  %v347_v6 = vld [vmem:[%s1822_s3] sm:$0x1] }
  0x1c   :  { %868 = vmatprep.subr.bf16.mxu0 %v916_v12  ;;  %896 = vmatprep.subr.bf16.mxu1 %v916_v12  ;;  %vm364_vm0 = vcmp.ge.s32.totalorder %v347_v6, 0  ;;  %v1217_v16 = vrot.slane %v347_v6, %v368_v9  ;;  %v1884_v6 = vmov 0 }
  0x1d   :  { %v365_v10 = vsel %vm364_vm0, 1, %v1024_v1  ;;  %v315_v1 = vadd.s32 24, %v1205_v8 }
  0x1e   :  { %425 = vperm.xlu1 %911, %v394_v19   ;;  %v1854_v19 = vmov 0 }
  0x1f   :  { %vm351_vm10 = vcmp.ne.s32.totalorder %v315_v1, %v1211_v13 }
  0x22   :  { %428 = vperm.xlu1 %911, %v395_v21   ;;  %v1856_v21 = vmov 0 }
  0x23   :  { %869 = vmatpush3.bf16.xpose.msra.mxu0 %v916_v12  ;;  %904 = vmatpush3.bf16.xpose.msra.mxu1 %v916_v12  ;;  %v1209_v12 = vrot.slane %v365_v10, %v368_v9  ;;  %v1886_v9 = vmov 0  ;;  %v324_v10 = vadd.s32 96, %v1205_v8 }
  0x24   :  { %870 = vmatprep.subr.bf16.mxu0 %v917_v17  ;;  %897 = vmatprep.subr.bf16.mxu1 %v917_v17 }
  0x25   :  { %vm370_vm2 = vcmp.eq.s32.totalorder %v1209_v12, 1 }
  0x26   :  { %434 = vperm.xlu1 %911, %v397_v22   ;;  %vm1225_vm5 = vmand %vm348_vm1, %vm370_vm2 }
  0x27   :  { %v1855_v19 = vsel %vm1225_vm5, 4294967295, %v1854_v19  ;;  %vm1234_vm8 = vmand %vm349_vm3, %vm370_vm2 }
  0x28   :  { %v1857_v21 = vsel %vm1234_vm8, 4294967295, %v1856_v21  ;;  %vm1249_vm12 = vmand %vm350_vm6, %vm370_vm2 }
  0x29   :  { %vm1267_vm0 = vmand %vm351_vm10, %vm370_vm2 }
  0x2a   :  { %440 = vperm.xlu1 %911, %v399_v24  }
  0x2b   :  { %871 = vmatpush3.bf16.xpose.msra.mxu0 %v917_v17  ;;  %905 = vmatpush3.bf16.xpose.msra.mxu1 %v917_v17 }
  0x2c   :  { %872 = vmatprep.subr.bf16.mxu0 %v918_v20  ;;  %898 = vmatprep.subr.bf16.mxu1 %v918_v20 }
  0x33   :  { %873 = vmatpush3.bf16.xpose.msra.mxu0 %v918_v20  ;;  %906 = vmatpush3.bf16.xpose.msra.mxu1 %v918_v20  ;;  %v316_v20 = vadd.s32 32, %v1205_v8 }
  0x34   :  { %874 = vmatprep.subr.bf16.mxu0 %v919_v23  ;;  %899 = vmatprep.subr.bf16.mxu1 %v919_v23 }
  0x35   :  { %vm352_vm14 = vcmp.ne.s32.totalorder %v316_v20, %v1211_v13  ;;  %v1895_v20 = vmov 0 }
  0x36   :  { %vm1285_vm6 = vmand %vm352_vm14, %vm370_vm2 }
  0x3b   :  { %875 = vmatpush3.bf16.xpose.msra.mxu0 %v919_v23  ;;  %907 = vmatpush3.bf16.xpose.msra.mxu1 %v919_v23  ;;  %v317_v23 = vadd.s32 40, %v1205_v8 }
  0x3d   :  { %vm353_vm3 = vcmp.ne.s32.totalorder %v317_v23, %v1211_v13 }
  0x3e   :  { %vm1300_vm14 = vmand %vm353_vm3, %vm370_vm2 }
  0x42   :  { %877 = vmatmul.mubr.bf16.vlgmr.msra.gmra.mrb[0].mxu0 %v922_v25  ;;  %885 = vmatmul.mubr.bf16.vlgmr.msra.gmra.mrb[0].mxu1 %v923_v26  ;;  %v1860_v25 = vmov 0 }
  0x43   :  { %880 = vmatprep.mubr.bf16.mxu0 %v924_v27  ;;  %888 = vmatprep.mubr.bf16.mxu1 %v926_v28  ;;  %v1861_v25 = vsel %vm1249_vm12, 4294967295, %v1860_v25  ;;  %v318_v27 = vadd.s32 48, %v1205_v8  ;;  %v1842_v28 = vmov 0.0  }
  0x45   :  { %vm354_vm10 = vcmp.ne.s32.totalorder %v318_v27, %v1211_v13 }
  0x46   :  { %vm1321_vm3 = vmand %vm354_vm10, %vm370_vm2 }
  0x4a   :  { %881 = vmatmul.mubr.bf16.gmra.mrb[4].mxu0 %v925_v29  ;;  %889 = vmatmul.mubr.bf16.gmra.mrb[4].mxu1 %v927_v30  ;;  %v1864_v30 = vmov 0 }
  0x4b   :  { %v1865_v30 = vsel %vm1267_vm0, 4294967295, %v1864_v30 }
  0x85   :  { %v408_v63 = vpop.permute.xlu1 %407  ;;  %v405_v18 = vpop.permute.xlu0 %404 }
  0x86   :  { %vm455_vm4 = vcmp.eq.s32.totalorder %v405_v18, %v1217_v16  ;;  %vm456_vm7 = vcmp.eq.s32.totalorder %v408_v63, %v1217_v16  ;;  %v1880_v63 = vmov 0 }
  0x87   :  { %vm1240_vm9 = vmand %vm455_vm4, %vm1225_vm5 }
  0x88   :  { %vm1255_vm13 = vmand %vm456_vm7, %vm1234_vm8  ;;  %v599_v29 = vsel %vm1240_vm9, 1.0, %v1842_v28 }
  0x89   :  { %v411_v2 = vpop.permute.xlu1 %410 }
  0x8a   :  { %vm457_vm11 = vcmp.eq.s32.totalorder %v411_v2, %v1217_v16  ;;  %v323_v2 = vadd.s32 88, %v1205_v8 }
  0x8b   :  { %vm1273_vm1 = vmand %vm457_vm11, %vm1249_vm12 }
  0x8d   :  { %v414_v4 = vpop.permute.xlu1 %413 }
  0x8e   :  { %vm458_vm15 = vcmp.eq.s32.totalorder %v414_v4, %v1217_v16 }
  0x8f   :  { %vm1291_vm7 = vmand %vm458_vm15, %vm1267_vm0 }
  0x91   :  { %v417_v7 = vpop.permute.xlu1 %416 }
  0x92   :  { %vm459_vm4 = vcmp.eq.s32.totalorder %v417_v7, %v1217_v16 }
  0x93   :  { %vm1306_vm15 = vmand %vm459_vm4, %vm1285_vm6 }
  0x94   :  { %v603_v4 = vsel %vm1306_vm15, 1.0, %v1842_v28 }
  0x95   :  { %v420_v11 = vpop.permute.xlu1 %419 }
  0x96   :  { %vm460_vm11 = vcmp.eq.s32.totalorder %v420_v11, %v1217_v16  ;;  %v1888_v11 = vmov 0 }
  0x97   :  { %vm1327_vm4 = vmand %vm460_vm11, %vm1300_vm14 }
  0x98   :  { %v604_v5 = vsel %vm1327_vm4, 1.0, %v1842_v28 }
  0x99   :  { %v423_v17 = vpop.permute.xlu1 %422 }
  0x9a   :  { %vm461_vm0 = vcmp.eq.s32.totalorder %v423_v17, %v1217_v16 }
  0x9b   :  { %vm1342_vm12 = vmand %vm461_vm0, %vm1321_vm3 }
  0x9c   :  { %v605_v17 = vsel %vm1342_vm12, 1.0, %v1842_v28 }
  0x9d   :  { %v426_v24 = vpop.permute.xlu1 %425 }
  0x9e   :  { %vm462_vm5 = vcmp.eq.s32.totalorder %v426_v24, %v1217_v16 }
 0x115   :  { %v878_v31 = vpop.f32.mrb[0].mxu0  ;;  %v886_v32 = vpop.f32.mrb[0].mxu1 }
 0x116   :  { %v1148_v33 = vmul.f32 14.285714, %v878_v31  ;;  %v1150_v34 = vmul.f32 14.285714, %v886_v32  ;;  %v183_v35 = vpop.f32.mrb[1].mxu0  ;;  %v215_v36 = vpop.f32.mrb[1].mxu1 }
 0x117   :  { %v879_v37 = vpop.f32.mrb[2].mxu0  ;;  %v887_v38 = vpop.f32.mrb[2].mxu1  ;;  %v1152_v39 = vmul.f32 14.285714, %v183_v35  ;;  %v1160_v45 = vmul.f32 14.285714, %v215_v36 }
 0x118   :  { %v1154_v40 = vmul.f32 14.285714, %v879_v37  ;;  %282 = vmax.xlane.f32.xlu0 %v1150_v34  ;;  %v218_v41 = vpop.f32.mrb[3].mxu1  ;;  %266 = vmax.xlane.f32.xlu1 %v1148_v33  ;;  %v186_v42 = vpop.f32.mrb[3].mxu0  ;;  %v1162_v46 = vmul.f32 14.285714, %v887_v38 }
 0x119   :  { %v1166_v53 = vmul.f32 14.285714, %v218_v41  ;;  %v1168_v54 = vmul.f32 14.285714, %v186_v42  ;;  %v319_v32 = vadd.s32 56, %v1205_v8  ;;  %v600_v35 = vsel %vm1255_vm13, 1.0, %v1842_v28  ;;  %v429_v41 = vpop.permute.xlu1 %428 }
 0x11a   :  { %v1868_v36 = vmov 0  ;;  %v320_v38 = vadd.s32 64, %v1205_v8  ;;  %v1872_v42 = vmov 0 }
 0x11b   :  { %v1869_v36 = vsel %vm1285_vm6, 4294967295, %v1868_v36  ;;  %v1873_v42 = vsel %vm1300_vm14, 4294967295, %v1872_v42  ;;  %vm355_vm8 = vcmp.ne.s32.totalorder %v319_v32, %v1211_v13  ;;  %vm463_vm14 = vcmp.eq.s32.totalorder %v429_v41, %v1217_v16 }
 0x11c   :  { %262 = vmax.xlane.f32.xlu0 %v1152_v39  ;;  %268 = vmax.xlane.f32.xlu1 %v1154_v40  ;;  %vm356_vm6 = vcmp.ne.s32.totalorder %v320_v38, %v1211_v13  ;;  %vm1336_vm10 = vmand %vm355_vm8, %vm370_vm2  ;;  %v1903_v38 = vmov 0  ;;  %v1906_v41 = vmov 0 }
 0x11d   :  { %v882_v43 = vpop.f32.mrb[4].mxu0  ;;  %v890_v44 = vpop.f32.mrb[4].mxu1  ;;  %v1881_v63 = vsel %vm1336_vm10, 4294967295, %v1880_v63  ;;  %vm1357_vm8 = vmand %vm356_vm6, %vm370_vm2 }
 0x11e   :  { %v199_v47 = vpop.f32.mrb[5].mxu0  ;;  %v231_v48 = vpop.f32.mrb[5].mxu1  ;;  %v1170_v55 = vmul.f32 14.285714, %v882_v43  ;;  %v1176_v57 = vmul.f32 14.285714, %v890_v44  ;;  %vm1363_vm0 = vmand %vm462_vm5, %vm1336_vm10  ;;  %vm359_vm5 = vcmp.ne.s32.totalorder %v323_v2, %v1211_v13 }
 0x11f   :  { %v883_v49 = vpop.f32.mrb[6].mxu0  ;;  %v891_v50 = vpop.f32.mrb[6].mxu1  ;;  %v1184_v59 = vmul.f32 14.285714, %v199_v47  ;;  %v1190_v61 = vmul.f32 14.285714, %v231_v48 }
 0x120   :  { %278 = vmax.xlane.f32.xlu0 %v1160_v45  ;;  %284 = vmax.xlane.f32.xlu1 %v1162_v46  ;;  %v202_v51 = vpop.f32.mrb[7].mxu0  ;;  %v234_v52 = vpop.f32.mrb[7].mxu1  ;;  %v1174_v56 = vmul.f32 14.285714, %v883_v49  ;;  %v1178_v58 = vmul.f32 14.285714, %v891_v50 }
 0x121   :  { %v1186_v60 = vmul.f32 14.285714, %v202_v51  ;;  %v1192_v62 = vmul.f32 14.285714, %v234_v52  ;;  %v432_v43 = vpop.permute.xlu0 %431  ;;  %v1874_v44 = vmov 0  ;;  %v321_v47 = vadd.s32 72, %v1205_v8 }
 0x122   :  { %v1875_v44 = vsel %vm1306_vm15, 4294967295, %v1874_v44  ;;  %v601_v48 = vsel %vm1273_vm1, 1.0, %v1842_v28  ;;  %v602_v49 = vsel %vm1291_vm7, 1.0, %v1842_v28  ;;  %v1876_v50 = vmov 0  ;;  %vm1378_vm15 = vmand %vm463_vm14, %vm1357_vm8 }
 0x123   :  { %v1877_v50 = vsel %vm1321_vm3, 4294967295, %v1876_v50  ;;  %v1878_v51 = vmov 0  ;;  %v322_v52 = vadd.s32 80, %v1205_v8  ;;  %vm357_vm11 = vcmp.ne.s32.totalorder %v321_v47, %v1211_v13 }
 0x124   :  { %280 = vmax.xlane.f32.xlu1 %v1166_v53  ;;  %264 = vmax.xlane.f32.xlu0 %v1168_v54  ;;  %v1879_v51 = vsel %vm1327_vm4, 4294967295, %v1878_v51  ;;  %v1885_v6 = vsel %vm1357_vm8, 4294967295, %v1884_v6  ;;  %v1887_v9 = vsel %vm1363_vm0, 4294967295, %v1886_v9  ;;  %vm464_vm4 = vcmp.eq.s32.totalorder %v432_v43, %v1217_v16  ;;  %vm1372_vm6 = vmand %vm357_vm11, %vm370_vm2 }
 0x125   :  { %v438_v7 = vpop.permute.xlu0 %437  ;;  %vm358_vm3 = vcmp.ne.s32.totalorder %v322_v52, %v1211_v13  ;;  %v1889_v11 = vsel %vm1372_vm6, 4294967295, %v1888_v11  ;;  %v1891_v14 = vsel %vm1378_vm15, 4294967295, %v1890_v14  ;;  %v606_v18 = vsel %vm1363_vm0, 1.0, %v1842_v28  ;;  %vm1399_vm11 = vmand %vm464_vm4, %vm1372_vm6 }
 0x126   :  { %1892 = vst [vmem:[#allocation2_spill] sm:$0xff] %v1891_v14  ;;  %vm1393_vm14 = vmand %vm358_vm3, %vm370_vm2  ;;  %v1896_v20 = vsel %vm1399_vm11, 4294967295, %v1895_v20  ;;  %vm360_vm8 = vcmp.ne.s32.totalorder %v324_v10, %v1211_v13  ;;  %vm361_vm4 = vcmp.ne.s32.totalorder %v325_v15, %v1211_v13  ;;  %v607_v32 = vsel %vm1378_vm15, 1.0, %v1842_v28 }
 0x127   :  { %1897 = vst [vmem:[#allocation3_spill] sm:$0xff] %v1896_v20  ;;  %vm1407_vm0 = vmand %vm359_vm5, %vm370_vm2  ;;  %v1909_v43 = vmov 0  ;;  %v1915_v52 = vmov 0 }
 0x128   :  { %274 = vmax.xlane.f32.xlu0 %v1170_v55  ;;  %276 = vmax.xlane.f32.xlu1 %v1174_v56  ;;  %vm1426_vm5 = vmand %vm360_vm8, %vm370_vm2 }
 0x129   :  { %v444_v27 = vpop.permute.xlu0 %443  ;;  %v1904_v38 = vsel %vm1426_vm5, 4294967295, %v1903_v38 }
 0x12a   :  { %1905 = vst [vmem:[#allocation5_spill] sm:$0xff] %v1904_v38  ;;  %vm468_vm15 = vcmp.eq.s32.totalorder %v444_v27, %v1217_v16 }
 0x12c   :  { %290 = vmax.xlane.f32.xlu0 %v1176_v57  ;;  %292 = vmax.xlane.f32.xlu1 %v1178_v58 }
 0x130   :  { %270 = vmax.xlane.f32.xlu0 %v1184_v59  ;;  %272 = vmax.xlane.f32.xlu1 %v1186_v60 }
 0x134   :  { %286 = vmax.xlane.f32.xlu0 %v1190_v61  ;;  %288 = vmax.xlane.f32.xlu1 %v1192_v62 }
 0x145   :  { %446 = vperm.xlu1 %911, %v401_v0   ;;  %v1882_v0 = vmov 0 }
 0x146   :  { %v1883_v0 = vsel %vm1342_vm12, 4294967295, %v1882_v0  ;;  %vm466_vm12 = vcmp.eq.s32.totalorder %v438_v7, %v1217_v16 }
 0x147   :  { %vm1433_vm6 = vmand %vm466_vm12, %vm1407_vm0 }
 0x148   :  { %v1907_v41 = vsel %vm1433_vm6, 4294967295, %v1906_v41 }
 0x149   :  { %1908 = vst [vmem:[#allocation6_spill] sm:$0xff] %v1907_v41 }
 0x14a   :  { %449 = vperm.xlu0 %910, %v402_v3   ;;  %v435_v3 = vpop.permute.xlu1 %434 }
 0x14b   :  { %vm465_vm10 = vcmp.eq.s32.totalorder %v435_v3, %v1217_v16 }
 0x14c   :  { %vm1413_vm3 = vmand %vm465_vm10, %vm1393_vm14 }
 0x14d   :  { %v609_v47 = vsel %vm1413_vm3, 1.0, %v1842_v28 }
 0x14e   :  { %v441_v23 = vpop.permute.xlu1 %440 }
 0x14f   :  { %vm467_vm10 = vcmp.eq.s32.totalorder %v441_v23, %v1217_v16 }
 0x150   :  { %vm1452_vm12 = vmand %vm467_vm10, %vm1426_vm5 }
 0x151   :  { %v611_v2 = vsel %vm1452_vm12, 1.0, %v1842_v28 }
 0x169   :  { %615 = vadd.xlane.f32.xlu0 %v599_v29  ;;  %617 = vadd.xlane.f32.xlu1 %v600_v35  ;;  %v1900_v29 = vmov 0  ;;  %v608_v35 = vsel %vm1399_vm11, 1.0, %v1842_v28  ;;  %vm1440_vm11 = vmand %vm361_vm4, %vm370_vm2 }
 0x16a   :  { %v1901_v29 = vsel %vm1413_vm3, 4294967295, %v1900_v29  ;;  %v1910_v43 = vsel %vm1440_vm11, 4294967295, %v1909_v43  ;;  %vm1458_vm8 = vmand %vm468_vm15, %vm1440_vm11 }
 0x16b   :  { %1902 = vst [vmem:[#allocation4_spill] sm:$0xff] %v1901_v29  ;;  %1911 = vst [vmem:[#allocation7_spill] sm:$0xff] %v1910_v43  ;;  %v1916_v52 = vsel %vm1458_vm8, 4294967295, %v1915_v52  ;;  %v612_v3 = vsel %vm1458_vm8, 1.0, %v1842_v28 }
 0x16c   :  { %1917 = vst [vmem:[#allocation9_spill] sm:$0xff] %v1916_v52  ;;  %v326_v52 = vadd.s32 112, %v1205_v8 }
 0x16d   :  { %619 = vadd.xlane.f32.xlu0 %v601_v48  ;;  %621 = vadd.xlane.f32.xlu1 %v602_v49  ;;  %v610_v48 = vsel %vm1433_vm6, 1.0, %v1842_v28  ;;  %v1912_v49 = vmov 0 }
 0x16e   :  { %v1913_v49 = vsel %vm1452_vm12, 4294967295, %v1912_v49  ;;  %vm362_vm15 = vcmp.ne.s32.totalorder %v326_v52, %v1211_v13 }
 0x16f   :  { %1914 = vst [vmem:[#allocation8_spill] sm:$0xff] %v1913_v49  ;;  %vm1479_vm4 = vmand %vm362_vm15, %vm370_vm2 }
 0x171   :  { %623 = vadd.xlane.f32.xlu0 %v603_v4  ;;  %625 = vadd.xlane.f32.xlu1 %v604_v5 }
 0x175   :  { %627 = vadd.xlane.f32.xlu0 %v605_v17  ;;  %629 = vadd.xlane.f32.xlu1 %v606_v18 }
 0x179   :  { %631 = vadd.xlane.f32.xlu0 %v607_v32  ;;  %633 = vadd.xlane.f32.xlu1 %v608_v35 }
 0x17d   :  { %635 = vadd.xlane.f32.xlu0 %v609_v47  ;;  %637 = vadd.xlane.f32.xlu1 %v610_v48 }
 0x181   :  { %639 = vadd.xlane.f32.xlu0 %v611_v2  ;;  %641 = vadd.xlane.f32.xlu1 %v612_v3  ;;  %v327_v3 = vadd.s32 120, %v1205_v8  ;;  %v1922_v8 = vmov 0.0  }
 0x183   :  { %vm363_vm12 = vcmp.ne.s32.totalorder %v327_v3, %v1211_v13 }
 0x184   :  { %vm1503_vm6 = vmand %vm363_vm12, %vm370_vm2  ;;  %vm1927_vm2 = vnez %v1883_v0  ;;  %vm1932_vm12 = vnez %v1855_v19 }
 0x1a5   :  { %v283_v4 = vpop.xlane.xlu0 %282  ;;  %v267_v5 = vpop.xlane.xlu1 %266 }
 0x1a6   :  { %v296_v20 = vsub.f32 %v1148_v33, %v267_v5  ;;  %v1498_v38 = vsub.f32 %v1150_v34, %v283_v4  ;;  %v1943_v33 = vld [vmem:[#allocation2_spill] sm:$0xff] }
 0x1a8   :  { %v649_v12 = vsel %vm1273_vm1, %v296_v20, 0.0  ;;  %vm1930_vm1 = vnez %v1879_v51 }
 0x1a9   :  { %v263_v7 = vpop.xlane.xlu0 %262  ;;  %v269_v10 = vpop.xlane.xlu1 %268 }
 0x1aa   :  { %v294_v13 = vsub.f32 %v1152_v39, %v263_v7  ;;  %v297_v34 = vsub.f32 %v1154_v40, %v269_v10 }
 0x1ac   :  { %v487_v39 = vmul.f32 1.442695, %v294_v13  ;;  %v650_v10 = vsel %vm1291_vm7, %v297_v34, 0.0  ;;  %v647_v31 = vsel %vm1240_vm9, %v294_v13, 0.0  ;;  %vm1928_vm9 = vnez %v1887_v9 }
 0x1ad   :  { %v279_v15 = vpop.xlane.xlu0 %278  ;;  %v285_v17 = vpop.xlane.xlu1 %284  ;;  %vm1931_vm7 = vnez %v1861_v25 }
 0x1ae   :  { %v1522_v4 = vsub.f32 %v1160_v45, %v279_v15  ;;  %v1531_v3 = vsub.f32 %v1162_v46, %v285_v17 }
 0x1b0   :  { %v503_v45 = vmul.f32 1.442695, %v1522_v4  ;;  %v509_v15 = vmul.f32 1.442695, %v1531_v3 }
 0x1b1   :  { %v281_v18 = vpop.xlane.xlu1 %280  ;;  %v265_v23 = vpop.xlane.xlu0 %264 }
 0x1b2   :  { %v295_v7 = vsub.f32 %v1168_v54, %v265_v23  ;;  %v1542_v46 = vsub.f32 %v1166_v53, %v281_v18 }
 0x1b4   :  { %v648_v37 = vsel %vm1255_vm13, %v295_v7, 0.0  ;;  %v489_v17 = vmul.f32 1.442695, %v295_v7  ;;  %vm1929_vm13 = vnez %v1875_v44  ;;  %v505_v0 = vmul.f32 1.442695, %v1542_v46 }
 0x1b5   :  { %v275_v27 = vpop.xlane.xlu0 %274  ;;  %v277_v32 = vpop.xlane.xlu1 %276 }
 0x1b6   :  { %v300_v40 = vsub.f32 %v1170_v55, %v275_v27  ;;  %v301_v54 = vsub.f32 %v1174_v56, %v277_v32 }
 0x1b8   :  { %v653_v22 = vsel %vm1927_vm2, %v300_v40, 0.0  ;;  %v499_v23 = vmul.f32 1.442695, %v300_v40  ;;  %v501_v27 = vmul.f32 1.442695, %v301_v54  ;;  %vm1934_vm2 = vnez %v1885_v6 }
 0x1b9   :  { %v1468_v35 = vpop.xlane.xlu0 %290  ;;  %v1470_v47 = vpop.xlane.xlu1 %292 }
 0x1ba   :  { %v1552_v53 = vsub.f32 %v1176_v57, %v1468_v35  ;;  %v1560_v32 = vsub.f32 %v1178_v58, %v1470_v47 }
 0x1bc   :  { %v515_v57 = vmul.f32 1.442695, %v1552_v53 }
 0x1bd   :  { %v273_v48 = vpop.xlane.xlu1 %272  ;;  %v271_v28 = vpop.xlane.xlu0 %270 }
 0x1be   :  { %v298_v55 = vsub.f32 %v1184_v59, %v271_v28  ;;  %v299_v56 = vsub.f32 %v1186_v60, %v273_v48  ;;  %v654_v59 = vsel %vm1928_vm9, %v301_v54, 0.0  ;;  %vm1936_vm9 = vnez %v1889_v11 }
 0x1c0   :  { %v651_v26 = vsel %vm1929_vm13, %v298_v55, 0.0  ;;  %v652_v60 = vsel %vm1930_vm1, %v299_v56, 0.0  ;;  %v497_v13 = vmul.f32 1.442695, %v299_v56  ;;  %vm1937_vm13 = vnez %v1877_v50 }
 0x1c1   :  { %v1473_v2 = vpop.xlane.xlu1 %288  ;;  %v1483_v41 = vpop.xlane.xlu0 %286  ;;  %vm1939_vm1 = vnez %v1869_v36 }
 0x1c2   :  { %v306_v58 = vsub.f32 %v1190_v61, %v1483_v41 }
 0x1c5   :  { %v447_v29 = vpop.permute.xlu1 %446 }
 0x1c6   :  { %vm469_vm10 = vcmp.eq.s32.totalorder %v447_v29, %v1217_v16  ;;  %v491_v29 = vmul.f32 1.442695, %v296_v20  ;;  %v493_v20 = vmul.f32 1.442695, %v297_v34  ;;  %v511_v34 = vmul.f32 1.442695, %v306_v58 }
 0x1c7   :  { %vm1489_vm8 = vmand %vm469_vm10, %vm1479_vm4 }
 0x1c8   :  { %v613_v52 = vsel %vm1489_vm8, 1.0, %v1922_v8  ;;  %928 = vpow2.f32 %v491_v29 }
 0x1c9   :  { %v450_v43 = vpop.permute.xlu0 %449  ;;  %643 = vadd.xlane.f32.xlu0 %v613_v52  ;;  %v495_v52 = vmul.f32 1.442695, %v298_v55 }
 0x1ca   :  { %vm470_vm15 = vcmp.eq.s32.totalorder %v450_v43, %v1217_v16  ;;  %v507_v43 = vmul.f32 1.442695, %v1498_v38 }
 0x1cb   :  { %vm1510_vm10 = vmand %vm470_vm15, %vm1503_vm6  ;;  %vm1933_vm15 = vnez %v1865_v30 }
 0x1cc   :  { %v614_v16 = vsel %vm1510_vm10, 1.0, %v1922_v8  ;;  %930 = vpow2.f32 %v507_v43  ;;  %v517_v8 = vmul.f32 1.442695, %v1560_v32 }
 0x1cd   :  { %645 = vadd.xlane.f32.xlu1 %v614_v16  ;;  %667 = vadd.xlane.f32.xlu0 %v649_v12  ;;  %932 = vpow2.f32 %v487_v39  ;;  %v307_v16 = vsub.f32 %v1192_v62, %v1473_v2 }
 0x1ce   :  { %934 = vpow2.f32 %v493_v20 }
 0x1cf   :  { %936 = vpow2.f32 %v503_v45  ;;  %v513_v6 = vmul.f32 1.442695, %v307_v16 }
 0x1d0   :  { %938 = vpow2.f32 %v509_v15  ;;  %v657_v15 = vsel %vm1413_vm3, %v1498_v38, 0.0  ;;  %v662_v38 = vsel %vm1510_vm10, %v1560_v32, 0.0  ;;  %vm807_vm3 = vcmask 7168  }
 0x1d1   :  { %669 = vadd.xlane.f32.xlu1 %v650_v10  ;;  %663 = vadd.xlane.f32.xlu0 %v647_v31  ;;  %940 = vpow2.f32 %v489_v17  ;;  %v1948_v17 = vld [vmem:[#allocation6_spill] sm:$0xff] }
 0x1d2   :  { %v929_v28 = vpop.eup %928  ;;  %942 = vpow2.f32 %v505_v0 }
 0x1d3   :  { %v521_v44 = vsel %vm1931_vm7, %v929_v28, 0.0  ;;  %944 = vpow2.f32 %v499_v23  ;;  %vm1940_vm7 = vnez %v1873_v42 }
 0x1d4   :  { %946 = vpow2.f32 %v501_v27 }
 0x1d5   :  { %665 = vadd.xlane.f32.xlu1 %v648_v37  ;;  %675 = vadd.xlane.f32.xlu0 %v653_v22  ;;  %948 = vpow2.f32 %v515_v57  ;;  %v1945_v37 = vld [vmem:[#allocation3_spill] sm:$0xff] }
 0x1d6   :  { %v931_v18 = vpop.eup %930  ;;  %950 = vpow2.f32 %v517_v8 }
 0x1d7   :  { %v933_v9 = vpop.eup %932  ;;  %v529_v25 = vsel %vm1393_vm14, %v931_v18, 0.0  ;;  %952 = vpow2.f32 %v495_v52  ;;  %vm1935_vm14 = vnez %v1857_v21 }
 0x1d8   :  { %v935_v35 = vpop.eup %934  ;;  %v519_v51 = vsel %vm1932_vm12, %v933_v9, 0.0  ;;  %954 = vpow2.f32 %v497_v13 }
 0x1d9   :  { %677 = vadd.xlane.f32.xlu1 %v654_v59  ;;  %671 = vadd.xlane.f32.xlu0 %v651_v26  ;;  %v937_v48 = vpop.eup %936  ;;  %v522_v29 = vsel %vm1933_vm15, %v935_v35, 0.0  ;;  %956 = vpow2.f32 %v511_v34  ;;  %v1950_v59 = vld [vmem:[#allocation8_spill] sm:$0xff] }
 0x1da   :  { %v939_v47 = vpop.eup %938  ;;  %v527_v19 = vsel %vm1934_vm2, %v937_v48, 0.0  ;;  %958 = vpow2.f32 %v513_v6 }
 0x1db   :  { %v941_v1 = vpop.eup %940  ;;  %v530_v61 = vsel %vm1407_vm0, %v939_v47, 0.0  ;;  %vm1938_vm0 = vnez %v1881_v63 }
 0x1dc   :  { %v943_v12 = vpop.eup %942  ;;  %v520_v30 = vsel %vm1935_vm14, %v941_v1, 0.0 }
 0x1dd   :  { %673 = vadd.xlane.f32.xlu1 %v652_v60  ;;  %539 = vadd.xlane.f32.xlu0 %v521_v44  ;;  %v945_v41 = vpop.eup %944  ;;  %v528_v39 = vsel %vm1936_vm9, %v943_v12, 0.0 }
 0x1de   :  { %v947_v43 = vpop.eup %946  ;;  %v525_v62 = vsel %vm1937_vm13, %v945_v41, 0.0 }
 0x1df   :  { %v949_v2 = vpop.eup %948  ;;  %v526_v21 = vsel %vm1938_vm0, %v947_v43, 0.0 }
 0x1e0   :  { %v951_v24 = vpop.eup %950  ;;  %v533_v7 = vsel %vm1479_vm4, %v949_v2, 0.0  ;;  %vm1946_vm4 = vnez %v1945_v37 }
 0x1e1   :  { %535 = vadd.xlane.f32.xlu1 %v519_v51  ;;  %555 = vadd.xlane.f32.xlu0 %v529_v25  ;;  %v953_v40 = vpop.eup %952  ;;  %v534_v11 = vsel %vm1503_vm6, %v951_v24, 0.0  ;;  %vm1944_vm6 = vnez %v1943_v33  ;;  %v656_v42 = vsel %vm1946_vm4, %v1542_v46, 0.0  ;;  %v661_v46 = vsel %vm1489_vm8, %v1552_v53, 0.0 }
 0x1e2   :  { %v955_v10 = vpop.eup %954  ;;  %v523_v50 = vsel %vm1939_vm1, %v953_v40, 0.0  ;;  %v655_v36 = vsel %vm1944_vm6, %v1522_v4, 0.0  ;;  %v1952_v4 = vld [vmem:[#allocation9_spill] sm:$0xff] }
 0x1e3   :  { %v957_v31 = vpop.eup %956  ;;  %v524_v63 = vsel %vm1940_vm7, %v955_v10, 0.0  ;;  %vm1953_vm12 = vnez %v1952_v4 }
 0x1e4   :  { %v531_v49 = vsel %vm1426_vm5, %v957_v31, 0.0  ;;  %v959_v45 = vpop.eup %958  ;;  %vm1949_vm5 = vnez %v1948_v17  ;;  %v660_v28 = vsel %vm1953_vm12, %v307_v16, 0.0 }
 0x1e5   :  { %541 = vadd.xlane.f32.xlu1 %v522_v29  ;;  %551 = vadd.xlane.f32.xlu0 %v527_v19  ;;  %v532_v55 = vsel %vm1440_vm11, %v959_v45, 0.0  ;;  %v658_v56 = vsel %vm1949_vm5, %v1531_v3, 0.0  ;;  %vm1951_vm11 = vnez %v1950_v59  ;;  %v777_v45 = vld [vmem:[%s1823_s4 + $0x10] sm:$0xff] }
 0x1e6   :  { %v659_v26 = vsel %vm1951_vm11, %v306_v58, 0.0 }
 0x1e9   :  { %557 = vadd.xlane.f32.xlu1 %v530_v61  ;;  %537 = vadd.xlane.f32.xlu0 %v520_v30 }
 0x1ed   :  { %553 = vadd.xlane.f32.xlu1 %v528_v39  ;;  %547 = vadd.xlane.f32.xlu0 %v525_v62 }
 0x1f1   :  { %549 = vadd.xlane.f32.xlu1 %v526_v21  ;;  %563 = vadd.xlane.f32.xlu0 %v533_v7 }
 0x1f5   :  { %565 = vadd.xlane.f32.xlu1 %v534_v11  ;;  %543 = vadd.xlane.f32.xlu0 %v523_v50 }
 0x1f6   :  { %v1620_v3 = vpop.xlane.xlu0 %615  ;;  %v1622_v0 = vpop.xlane.xlu1 %617 }
 0x1f7   :  { %v727_v16 = vmax.f32 %v1620_v3, 1.0  ;;  %v728_v30 = vmax.f32 %v1622_v0, 1.0 }
 0x1f9   :  { %545 = vadd.xlane.f32.xlu1 %v524_v63  ;;  %559 = vadd.xlane.f32.xlu0 %v531_v49 }
 0x1fa   :  { %v620_v23 = vpop.xlane.xlu0 %619  ;;  %v1624_v18 = vpop.xlane.xlu1 %621 }
 0x1fb   :  { %v729_v34 = vmax.f32 %v620_v23, 1.0  ;;  %v730_v41 = vmax.f32 %v1624_v18, 1.0 }
 0x1fd   :  { %561 = vadd.xlane.f32.xlu1 %v532_v55  ;;  %679 = vadd.xlane.f32.xlu0 %v655_v36 }
 0x1fe   :  { %v1626_v60 = vpop.xlane.xlu0 %623  ;;  %v1628_v44 = vpop.xlane.xlu1 %625 }
 0x1ff   :  { %v731_v6 = vmax.f32 %v1626_v60, 1.0  ;;  %v732_v2 = vmax.f32 %v1628_v44, 1.0 }
 0x201   :  { %681 = vadd.xlane.f32.xlu1 %v656_v42  ;;  %683 = vadd.xlane.f32.xlu0 %v657_v15 }
 0x202   :  { %v1630_v14 = vpop.xlane.xlu0 %627  ;;  %v1632_v53 = vpop.xlane.xlu1 %629 }
 0x203   :  { %v733_v24 = vmax.f32 %v1630_v14, 1.0  ;;  %v734_v50 = vmax.f32 %v1632_v53, 1.0 }
 0x205   :  { %685 = vadd.xlane.f32.xlu1 %v658_v56  ;;  %687 = vadd.xlane.f32.xlu0 %v659_v26 }
 0x206   :  { %v1634_v9 = vpop.xlane.xlu0 %631  ;;  %v1636_v5 = vpop.xlane.xlu1 %633 }
 0x207   :  { %v735_v37 = vmax.f32 %v1634_v9, 1.0  ;;  %v736_v15 = vmax.f32 %v1636_v5, 1.0 }
 0x209   :  { %689 = vadd.xlane.f32.xlu1 %v660_v28  ;;  %691 = vadd.xlane.f32.xlu0 %v661_v46 }
 0x20a   :  { %v1638_v27 = vpop.xlane.xlu0 %635  ;;  %v1640_v32 = vpop.xlane.xlu1 %637 }
 0x20d   :  { %693 = vadd.xlane.f32.xlu1 %v662_v38  ;;  %v775_v38 = vld [vmem:[%s1823_s4] sm:$0xff] }
 0x20e   :  { %v1642_v57 = vpop.xlane.xlu0 %639  ;;  %v1644_v35 = vpop.xlane.xlu1 %641 }
 0x256   :  { %v1646_v51 = vpop.xlane.xlu0 %643 }
 0x25a   :  { %v668_v25 = vpop.xlane.xlu0 %667  ;;  %v1648_v48 = vpop.xlane.xlu1 %645 }
 0x25e   :  { %v1650_v8 = vpop.xlane.xlu0 %663  ;;  %v1652_v52 = vpop.xlane.xlu1 %669 }
 0x262   :  { %v1654_v58 = vpop.xlane.xlu0 %675  ;;  %v1656_v47 = vpop.xlane.xlu1 %665 }
 0x266   :  { %v1658_v29 = vpop.xlane.xlu0 %671  ;;  %v1660_v19 = vpop.xlane.xlu1 %677 }
 0x26a   :  { %v540_v1 = vpop.xlane.xlu0 %539  ;;  %v1662_v13 = vpop.xlane.xlu1 %673 }
 0x26b   :  { %960 = vlog2.f32 %v540_v1 }
 0x26e   :  { %v556_v12 = vpop.xlane.xlu0 %555  ;;  %v536_v61 = vpop.xlane.xlu1 %535 }
 0x26f   :  { %962 = vlog2.f32 %v536_v61 }
 0x270   :  { %964 = vrcp.f32 %v729_v34 }
 0x271   :  { %966 = vrcp.f32 %v727_v16 }
 0x272   :  { %v552_v43 = vpop.xlane.xlu0 %551  ;;  %v542_v39 = vpop.xlane.xlu1 %541  ;;  %968 = vrcp.f32 %v728_v30 }
 0x273   :  { %970 = vlog2.f32 %v542_v39 }
 0x274   :  { %972 = vrcp.f32 %v730_v41 }
 0x275   :  { %v961_v62 = vpop.eup %960  ;;  %974 = vrcp.f32 %v731_v6 }
 0x276   :  { %v572_v21 = vmul.f32 0.6931472, %v961_v62  ;;  %v538_v7 = vpop.xlane.xlu0 %537  ;;  %v558_v40 = vpop.xlane.xlu1 %557  ;;  %v738_v62 = vmax.f32 %v1640_v32, 1.0 }
 0x277   :  { %976 = vlog2.f32 %v538_v7 }
 0x278   :  { %v697_v10 = vmul.f32 %v620_v23, %v572_v21  ;;  %978 = vlog2.f32 %v552_v43  ;;  %v737_v23 = vmax.f32 %v1638_v27, 1.0  ;;  %v778_v43 = vld [vmem:[%s1823_s4 + $0x18] sm:$0xff]  ;;  %v739_v21 = vmax.f32 %v1642_v57, 1.0 }
 0x279   :  { %980 = vrcp.f32 %v732_v2  ;;  %v963_v11 = vpop.eup %962 }
 0x27a   :  { %982 = vrcp.f32 %v733_v24  ;;  %v713_v31 = vsub.f32 %v668_v25, %v697_v10  ;;  %v548_v63 = vpop.xlane.xlu0 %547  ;;  %v554_v20 = vpop.xlane.xlu1 %553  ;;  %v568_v54 = vmul.f32 0.6931472, %v963_v11 }
 0x27b   :  { %v965_v49 = vpop.eup %964  ;;  %984 = vlog2.f32 %v548_v63 }
 0x27c   :  { %v967_v55 = vpop.eup %966  ;;  %v748_v33 = vmul.f32 %v965_v49, %v713_v31  ;;  %986 = vlog2.f32 %v556_v12  ;;  %v695_v42 = vmul.f32 %v1620_v3, %v568_v54  ;;  %v776_v31 = vld [vmem:[%s1823_s4 + $0x8] sm:$0xff] }
 0x27d   :  { %v969_v36 = vpop.eup %968  ;;  %988 = vlog2.f32 %v554_v20  ;;  %v741_v20 = vmax.f32 %v1646_v51, 1.0 }
 0x27e   :  { %v971_v22 = vpop.eup %970  ;;  %990 = vrcp.f32 %v734_v50  ;;  %v793_v17 = vmul.f32 %v777_v45, %v748_v33  ;;  %v564_v56 = vpop.xlane.xlu0 %563  ;;  %v711_v4 = vsub.f32 %v1650_v8, %v695_v42 }
 0x27f   :  { %v550_v59 = vpop.xlane.xlu1 %549  ;;  %v973_v26 = vpop.eup %972  ;;  %v574_v28 = vmul.f32 0.6931472, %v971_v22  ;;  %992 = vlog2.f32 %v558_v40 }
 0x280   :  { %v1678_v46 = vpop.eup %974  ;;  %810 = vst.msk [vmem:[%s1824_s5 + $0x10] sm:$0xff] %vm807_vm3, %v793_v17  ;;  %994 = vlog2.f32 %v550_v59  ;;  %v744_v25 = vmul.f32 %v967_v55, %v711_v4  ;;  %v781_v17 = vld [vmem:[%s1823_s4 + $0x30] sm:$0xff]  ;;  %v740_v4 = vmax.f32 %v1644_v35, 1.0 }
 0x281   :  { %v977_v3 = vpop.eup %976  ;;  %996 = vrcp.f32 %v735_v37  ;;  %v698_v8 = vmul.f32 %v1624_v18, %v574_v28 }
 0x282   :  { %v979_v1 = vpop.eup %978  ;;  %998 = vrcp.f32 %v736_v15  ;;  %v570_v34 = vmul.f32 0.6931472, %v977_v3  ;;  %v544_v16 = vpop.xlane.xlu0 %543  ;;  %v791_v30 = vmul.f32 %v775_v38, %v744_v25 }
 0x283   :  { %v566_v12 = vpop.xlane.xlu1 %565  ;;  %v1689_v61 = vpop.eup %980  ;;  %v714_v41 = vsub.f32 %v1652_v52, %v698_v8  ;;  %1000 = vlog2.f32 %v544_v16  ;;  %v584_v2 = vmul.f32 0.6931472, %v979_v1  ;;  %v742_v1 = vmax.f32 %v1648_v48, 1.0 }
 0x284   :  { %v983_v6 = vpop.eup %982  ;;  %v696_v39 = vmul.f32 %v1622_v0, %v570_v34  ;;  %1002 = vlog2.f32 %v564_v56  ;;  %808 = vst.msk [vmem:[%s1824_s5] sm:$0xff] %vm807_vm3, %v791_v30 }
 0x285   :  { %v985_v18 = vpop.eup %984  ;;  %1004 = vrcp.f32 %v737_v23  ;;  %v750_v52 = vmul.f32 %v973_v26, %v714_v41  ;;  %v703_v55 = vmul.f32 %v1634_v9, %v584_v2 }
 0x286   :  { %v987_v24 = vpop.eup %986  ;;  %v712_v7 = vsub.f32 %v1656_v47, %v696_v39  ;;  %v580_v40 = vmul.f32 0.6931472, %v985_v18  ;;  %1006 = vlog2.f32 %v566_v12  ;;  %v560_v0 = vpop.xlane.xlu0 %559 }
 0x287   :  { %v546_v10 = vpop.xlane.xlu1 %545  ;;  %v989_v11 = vpop.eup %988  ;;  %v794_v50 = vmul.f32 %v778_v43, %v750_v52  ;;  %1008 = vlog2.f32 %v560_v0  ;;  %v588_v47 = vmul.f32 0.6931472, %v987_v24 }
 0x288   :  { %v991_v63 = vpop.eup %990  ;;  %v746_v49 = vmul.f32 %v969_v36, %v712_v7  ;;  %v701_v45 = vmul.f32 %v1630_v14, %v580_v40  ;;  %1010 = vlog2.f32 %v546_v10  ;;  %v586_v22 = vmul.f32 0.6931472, %v989_v11  ;;  %v784_v7 = vld [vmem:[%s1823_s4 + $0x48] sm:$0xff] }
 0x289   :  { %v993_v54 = vpop.eup %992  ;;  %1012 = vrcp.f32 %v738_v62  ;;  %811 = vst.msk [vmem:[%s1824_s5 + $0x18] sm:$0xff] %vm807_vm3, %v794_v50  ;;  %v705_v25 = vmul.f32 %v1638_v27, %v588_v47 }
 0x28a   :  { %v995_v33 = vpop.eup %994  ;;  %1014 = vrcp.f32 %v739_v21  ;;  %v792_v37 = vmul.f32 %v776_v31, %v746_v49  ;;  %v717_v42 = vsub.f32 %v1654_v58, %v701_v45  ;;  %v680_v36 = vpop.xlane.xlu0 %679  ;;  %v783_v58 = vld [vmem:[%s1823_s4 + $0x40] sm:$0xff]  ;;  %v590_v38 = vmul.f32 0.6931472, %v993_v54 }
 0x28b   :  { %v562_v15 = vpop.xlane.xlu1 %561  ;;  %v997_v14 = vpop.eup %996  ;;  %v582_v56 = vmul.f32 0.6931472, %v995_v33  ;;  %v719_v59 = vsub.f32 %v680_v36, %v703_v55  ;;  %v704_v30 = vmul.f32 %v1636_v5, %v586_v22  ;;  %v785_v5 = vld [vmem:[%s1823_s4 + $0x50] sm:$0xff]  ;;  %v779_v49 = vld [vmem:[%s1823_s4 + $0x20] sm:$0xff] }
 0x28c   :  { %1016 = vlog2.f32 %v562_v15  ;;  %v999_v26 = vpop.eup %998  ;;  %809 = vst.msk [vmem:[%s1824_s5 + $0x8] sm:$0xff] %vm807_vm3, %v792_v37  ;;  %v756_v9 = vmul.f32 %v983_v6, %v717_v42 }
 0x28d   :  { %1018 = vrcp.f32 %v741_v20  ;;  %v1001_v28 = vpop.eup %1000  ;;  %v702_v3 = vmul.f32 %v1632_v53, %v582_v56  ;;  %v760_v23 = vmul.f32 %v997_v14, %v719_v59  ;;  %v782_v53 = vld [vmem:[%s1823_s4 + $0x38] sm:$0xff] }
 0x28e   :  { %v1003_v8 = vpop.eup %1002  ;;  %v797_v34 = vmul.f32 %v781_v17, %v756_v9  ;;  %v576_v16 = vmul.f32 0.6931472, %v1001_v28  ;;  %v684_v12 = vpop.xlane.xlu0 %683  ;;  %1020 = vrcp.f32 %v740_v4  ;;  %v787_v4 = vld [vmem:[%s1823_s4 + $0x60] sm:$0xff] }
 0x28f   :  { %v682_v41 = vpop.xlane.xlu1 %681  ;;  %v1005_v6 = vpop.eup %1004  ;;  %v718_v43 = vsub.f32 %v1660_v19, %v702_v3  ;;  %v799_v39 = vmul.f32 %v783_v58, %v760_v23  ;;  %v721_v18 = vsub.f32 %v684_v12, %v705_v25  ;;  %v596_v52 = vmul.f32 0.6931472, %v1003_v8 }
 0x290   :  { %v1007_v62 = vpop.eup %1006  ;;  %814 = vst.msk [vmem:[%s1824_s5 + $0x30] sm:$0xff] %vm807_vm3, %v797_v34  ;;  %v699_v27 = vmul.f32 %v1626_v60, %v576_v16  ;;  %v720_v19 = vsub.f32 %v682_v41, %v704_v30  ;;  %v706_v60 = vmul.f32 %v1640_v32, %v590_v38  ;;  %1022 = vrcp.f32 %v742_v1 }
 0x291   :  { %v1009_v2 = vpop.eup %1008  ;;  %v758_v24 = vmul.f32 %v991_v63, %v718_v43  ;;  %816 = vst.msk [vmem:[%s1824_s5 + $0x40] sm:$0xff] %vm807_vm3, %v799_v39  ;;  %v764_v21 = vmul.f32 %v1005_v6, %v721_v18  ;;  %v598_v22 = vmul.f32 0.6931472, %v1007_v62 }
 0x292   :  { %v1011_v40 = vpop.eup %1010  ;;  %v715_v0 = vsub.f32 %v1658_v29, %v699_v27  ;;  %v592_v10 = vmul.f32 0.6931472, %v1009_v2  ;;  %v762_v11 = vmul.f32 %v999_v26, %v720_v19  ;;  %v688_v50 = vpop.xlane.xlu0 %687  ;;  %v786_v29 = vld [vmem:[%s1823_s4 + $0x58] sm:$0xff] }
 0x293   :  { %v686_v31 = vpop.xlane.xlu1 %685  ;;  %v1013_v63 = vpop.eup %1012  ;;  %v798_v20 = vmul.f32 %v782_v53, %v758_v24  ;;  %v578_v45 = vmul.f32 0.6931472, %v1011_v40  ;;  %v801_v54 = vmul.f32 %v785_v5, %v764_v21  ;;  %v710_v25 = vmul.f32 %v1648_v48, %v598_v22  ;;  %v790_v48 = vld [vmem:[%s1823_s4 + $0x78] sm:$0xff] }
 0x294   :  { %v722_v47 = vsub.f32 %v686_v31, %v706_v60  ;;  %v1015_v55 = vpop.eup %1014  ;;  %v752_v32 = vmul.f32 %v1678_v46, %v715_v0  ;;  %v800_v33 = vmul.f32 %v784_v7, %v762_v11  ;;  %v707_v37 = vmul.f32 %v1642_v57, %v592_v10 }
 0x295   :  { %815 = vst.msk [vmem:[%s1824_s5 + $0x38] sm:$0xff] %vm807_vm3, %v798_v20  ;;  %v700_v36 = vmul.f32 %v1628_v44, %v578_v45  ;;  %818 = vst.msk [vmem:[%s1824_s5 + $0x50] sm:$0xff] %vm807_vm3, %v801_v54  ;;  %v709_v57 = vmul.f32 %v1646_v51, %v596_v52  ;;  %v780_v51 = vld [vmem:[%s1823_s4 + $0x28] sm:$0xff] }
 0x296   :  { %v1017_v42 = vpop.eup %1016  ;;  %v766_v46 = vmul.f32 %v1013_v63, %v722_v47  ;;  %v795_v14 = vmul.f32 %v779_v49, %v752_v32  ;;  %817 = vst.msk [vmem:[%s1824_s5 + $0x48] sm:$0xff] %vm807_vm3, %v800_v33  ;;  %v723_v56 = vsub.f32 %v688_v50, %v707_v37  ;;  %v692_v59 = vpop.xlane.xlu0 %691 }
 0x297   :  { %v1019_v15 = vpop.eup %1018  ;;  %v594_v17 = vmul.f32 0.6931472, %v1017_v42  ;;  %v690_v26 = vpop.xlane.xlu1 %689  ;;  %v716_v44 = vsub.f32 %v1662_v13, %v700_v36  ;;  %v725_v58 = vsub.f32 %v692_v59, %v709_v57  ;;  %v789_v13 = vld [vmem:[%s1823_s4 + $0x70] sm:$0xff] }
 0x298   :  { %v802_v9 = vmul.f32 %v786_v29, %v766_v46  ;;  %812 = vst.msk [vmem:[%s1824_s5 + $0x20] sm:$0xff] %vm807_vm3, %v795_v14  ;;  %v768_v28 = vmul.f32 %v1015_v55, %v723_v56  ;;  %v1021_v8 = vpop.eup %1020 }
 0x299   :  { %v708_v38 = vmul.f32 %v1644_v35, %v594_v17  ;;  %v754_v3 = vmul.f32 %v1689_v61, %v716_v44  ;;  %v772_v23 = vmul.f32 %v1019_v15, %v725_v58  ;;  %v788_v35 = vld [vmem:[%s1823_s4 + $0x68] sm:$0xff] }
 0x29a   :  { %819 = vst.msk [vmem:[%s1824_s5 + $0x58] sm:$0xff] %vm807_vm3, %v802_v9  ;;  %v803_v1 = vmul.f32 %v787_v4, %v768_v28  ;;  %v1023_v61 = vpop.eup %1022 }
 0x29b   :  { %v724_v34 = vsub.f32 %v690_v26, %v708_v38  ;;  %v694_v16 = vpop.xlane.xlu1 %693  ;;  %v796_v12 = vmul.f32 %v780_v51, %v754_v3  ;;  %v805_v30 = vmul.f32 %v789_v13, %v772_v23 }
 0x29c   :  { %v726_v41 = vsub.f32 %v694_v16, %v710_v25  ;;  %820 = vst.msk [vmem:[%s1824_s5 + $0x60] sm:$0xff] %vm807_vm3, %v803_v1 }
 0x29d   :  { %v770_v6 = vmul.f32 %v1021_v8, %v724_v34  ;;  %813 = vst.msk [vmem:[%s1824_s5 + $0x28] sm:$0xff] %vm807_vm3, %v796_v12  ;;  %822 = vst.msk [vmem:[%s1824_s5 + $0x70] sm:$0xff] %vm807_vm3, %v805_v30 }
 0x29e   :  { %v774_v43 = vmul.f32 %v1023_v61, %v726_v41 }
 0x29f   :  { %v804_v39 = vmul.f32 %v788_v35, %v770_v6 }
 0x2a0   :  { %v806_v18 = vmul.f32 %v790_v48, %v774_v43 }
 0x2a1   :  { %821 = vst.msk [vmem:[%s1824_s5 + $0x68] sm:$0xff] %vm807_vm3, %v804_v39 }
 0x2a2   :  { %823 = vst.msk [vmem:[%s1824_s5 + $0x78] sm:$0xff] %vm807_vm3, %v806_v18 }

</bundles_post_ra>
